<compile_context>
chip_gen: v7x
topology: tpu7x:2x2x1
jax: 0.10.0
libtpu: 0.0.40
codegen_flags: <defaults>
</compile_context>

<pallas_src>
import functools

import jax
import jax.numpy as jnp
from jax.experimental import pallas as pl
from jax.experimental.pallas import tpu as pltpu

LANE, SUB = 128, 8


def _round_up(n, m):
    return ((n + m - 1) // m) * m


# ----------------------------------------------------------------------------
# Fused kernel: embedding + ReLU + hoisted gate matmul + GRU recurrence.
# Gate order (r, z, n) and the update rule match PyTorch nn.GRU:
#   r = sig(x Wir^T + bir + h Whr^T + bhr)
#   z = sig(x Wiz^T + biz + h Whz^T + bhz)
#   n = tanh(x Win^T + bin + r * (h Whn^T + bhn))
#   h' = (1 - z) * n + z * h   ==   n + z * (h - n)
# ----------------------------------------------------------------------------
def encoder_gru_kernel(x_ref, h0_ref, wemb_ref, bemb_ref, wih_ref, bgx_ref,
                       whh_ref, bhn_ref, out_ref, gx_ref,
                       *, seq_len, batch_p, hidden_p):
    cd = wemb_ref.dtype  # matmul operand dtype (f32 or bf16); accumulation always f32

    # 1) embedding + ReLU for all S*Bp tokens in one MXU matmul.
    emb = jnp.dot(x_ref[...].astype(cd), wemb_ref[...],
                  preferred_element_type=jnp.float32)
    emb = jnp.maximum(emb + bemb_ref[...], 0.0)

    # 2) input-to-hidden gate pre-activations for ALL timesteps, 3 gates fused
    #    (lane-dense 3*Hp), hoisted off the serial path.
    #    b_ih (+ folded b_hh_{r,z}) is already baked into bgx.
    gx_ref[...] = (jnp.dot(emb.astype(cd), wih_ref[...],
                           preferred_element_type=jnp.float32) + bgx_ref[...])

    # 3) serial recurrence: only h @ W_hh remains inside the loop.
    #    h is carried as a loop VALUE (stays in vregs); W_hh is read at the dot site
    #    so the matmul streams it from VMEM (no 48-vreg live range across the unroll).
    bhn = jnp.broadcast_to(bhn_ref[...], (batch_p, hidden_p))   # broadcast hoisted

    def step(t, h):
        row = pl.multiple_of(t * batch_p, batch_p)
        gx = gx_ref[pl.ds(row, batch_p), :]                     # (Bp, 3*Hp)
        gh = jnp.dot(h.astype(cd), whh_ref[...],
                     preferred_element_type=jnp.float32)
        r = jax.nn.sigmoid(gx[:, :hidden_p] + gh[:, :hidden_p])
        z = jax.nn.sigmoid(gx[:, hidden_p:2 * hidden_p] + gh[:, hidden_p:2 * hidden_p])
        n = jnp.tanh(gx[:, 2 * hidden_p:] + r * (gh[:, 2 * hidden_p:] + bhn))
        h_new = n + z * (h - n)                                  # == (1-z)*n + z*h
        out_ref[t] = h_new
        return h_new

    jax.lax.fori_loop(0, seq_len, step, h0_ref[...], unroll=True)


def encoder_gru_pallas(x2d, h0, wemb, bemb, wih, bgx, whh, bhn, *, seq_len):
    batch_p, hidden_p = h0.shape
    kernel = functools.partial(encoder_gru_kernel, seq_len=seq_len,
                               batch_p=batch_p, hidden_p=hidden_p)
    return pl.pallas_call(
        kernel,
        out_shape=jax.ShapeDtypeStruct((seq_len, batch_p, hidden_p), jnp.float32),
        grid=(1,),
        in_specs=[
            pl.BlockSpec(x2d.shape, lambda i: (0, 0)),    # (S*Bp, Hp) time-major tokens
            pl.BlockSpec(h0.shape, lambda i: (0, 0)),     # (Bp, Hp) initial hidden
            pl.BlockSpec(wemb.shape, lambda i: (0, 0)),   # (Hp, Hp) embedding W^T
            pl.BlockSpec(bemb.shape, lambda i: (0, 0)),   # (1, Hp)
            pl.BlockSpec(wih.shape, lambda i: (0, 0)),    # (Hp, 3Hp) fused W_ih^T
            pl.BlockSpec(bgx.shape, lambda i: (0, 0)),    # (1, 3Hp) fused bias
            pl.BlockSpec(whh.shape, lambda i: (0, 0)),    # (Hp, 3Hp) fused W_hh^T
            pl.BlockSpec(bhn.shape, lambda i: (0, 0)),    # (1, Hp) b_hh_n
        ],
        out_specs=pl.BlockSpec((seq_len, batch_p, hidden_p), lambda i: (0, 0, 0)),
        scratch_shapes=[
            pltpu.VMEM((seq_len * batch_p, 3 * hidden_p), jnp.float32),  # GX, all steps
        ],
        compiler_params=pltpu.CompilerParams(dimension_semantics=("arbitrary",)),
    )(x2d, h0, wemb, bemb, wih, bgx, whh, bhn)


# ----------------------------------------------------------------------------
# One-time weight repacking (hoisted out of the per-call path).
# ----------------------------------------------------------------------------
def pack_encoder_params(params, compute_dtype=jnp.float32):
    H, I = params["w_emb"].shape
    assert I == H, "module constraint: GRU(input_size=I) is fed the (.,H) embedding"
    Hp = _round_up(max(H, I), LANE)
    f32 = jnp.float32

    # embedding (nn.Linear): y = x @ W^T + b, W is (H, I)
    wemb = jnp.pad(params["w_emb"].T, ((0, Hp - I), (0, Hp - H))).astype(compute_dtype)
    bemb = jnp.pad(params["b_emb"], (0, Hp - H))[None, :].astype(f32)

    # GRU weights repacked as fused, per-gate-padded (r|z|n) column blocks.
    w_ih = jnp.transpose(params["w_ih"].reshape(3, H, I), (0, 2, 1))     # (3, I, H)
    w_ih = jnp.pad(w_ih, ((0, 0), (0, Hp - I), (0, Hp - H)))             # (3, Hp, Hp)
    wih = jnp.transpose(w_ih, (1, 0, 2)).reshape(Hp, 3 * Hp).astype(compute_dtype)

    w_hh = jnp.transpose(params["w_hh"].reshape(3, H, H), (0, 2, 1))
    w_hh = jnp.pad(w_hh, ((0, 0), (0, Hp - H), (0, Hp - H)))
    whh = jnp.transpose(w_hh, (1, 0, 2)).reshape(Hp, 3 * Hp).astype(compute_dtype)

    b_ih = params["b_ih"].reshape(3, H)
    b_hh = params["b_hh"].reshape(3, H)
    # fold b_hh_r, b_hh_z into the hoisted GX bias; b_hh_n must stay inside r*( . )
    b_gx = b_ih.at[0].add(b_hh[0]).at[1].add(b_hh[1])
    bgx = jnp.pad(b_gx, ((0, 0), (0, Hp - H))).reshape(1, 3 * Hp).astype(f32)
    bhn = jnp.pad(b_hh[2], (0, Hp - H))[None, :].astype(f32)

    # Invariant: all pad lanes/rows above are zeros (jnp.pad default) — required so
    # padded hidden lanes stay exactly 0 through the recurrence.
    return dict(wemb=wemb, bemb=bemb, wih=wih, bgx=bgx, whh=whh, bhn=bhn)


# ----------------------------------------------------------------------------
# Per-call forward: pad/transpose x + h0, run kernel, strip padding. One jit.
# ----------------------------------------------------------------------------
@functools.partial(jax.jit, static_argnames=("hidden_size",))
def encoder_rnn_forward(packed, x, hidden, hidden_size):
    """Returns (output (B,S,H), hidden (1,B,H)) — same semantics as EncoderRNN.forward."""
    B, S, I = x.shape
    H = hidden_size
    Hp = packed["wemb"].shape[0]
    Bp = _round_up(B, SUB)
    f32 = jnp.float32

    # input: pad, go time-major, flatten to (S*Bp, Hp) for one big matmul
    x_tm = jnp.transpose(x, (1, 0, 2))                                   # (S, B, I)
    x_tm = jnp.pad(x_tm, ((0, 0), (0, Bp - B), (0, Hp - I)))
    x2d = x_tm.reshape(S * Bp, Hp).astype(f32)

    # initial hidden (PyTorch h0 convention (1, B, H)); padded lanes stay 0 by design
    h0 = jnp.pad(hidden[0], ((0, Bp - B), (0, Hp - H))).astype(f32)

    out_p = encoder_gru_pallas(x2d, h0, packed["wemb"], packed["bemb"], packed["wih"],
                               packed["bgx"], packed["whh"], packed["bhn"], seq_len=S)

    out_sbh = out_p[:, :B, :H]                      # strip padding
    output = jnp.transpose(out_sbh, (1, 0, 2))      # back to batch_first (B, S, H)
    hn = out_sbh[S - 1][None, :, :]                 # final hidden == last output step
    return output, hn


# ----------------------------------------------------------------------------
# Pure-JAX reference for verification.
# ----------------------------------------------------------------------------
def encoder_rnn_reference(params, x, hidden):
    H = params["w_emb"].shape[0]
    emb = jax.nn.relu(x @ params["w_emb"].T + params["b_emb"])
    w_ih, w_hh = params["w_ih"], params["w_hh"]
    b_ih, b_hh = params["b_ih"], params["b_hh"]

    def step(h, x_t):
        gx = x_t @ w_ih.T + b_ih
        gh = h @ w_hh.T + b_hh
        r = jax.nn.sigmoid(gx[:, :H] + gh[:, :H])
        z = jax.nn.sigmoid(gx[:, H:2 * H] + gh[:, H:2 * H])
        n = jnp.tanh(gx[:, 2 * H:] + r * gh[:, 2 * H:])
        h_new = (1.0 - z) * n + z * h
        return h_new, h_new

    hn, out_sbh = jax.lax.scan(step, hidden[0], emb.transpose(1, 0, 2))
    return out_sbh.transpose(1, 0, 2), hn[None, :, :]


if __name__ == "__main__":
    B, S = 16, 8          # batch_size = 16 in the spec
    I = H = 50            # hidden_size = 50; module requires input_size == hidden_size

    key = jax.random.PRNGKey(0)
    ks = jax.random.split(key, 7)
    s_emb = 1.0 / float(jnp.sqrt(jnp.float32(I)))
    s_gru = 1.0 / float(jnp.sqrt(jnp.float32(H)))
    params = {
        "w_emb": jax.random.uniform(ks[0], (H, I), jnp.float32, -s_emb, s_emb),
        "b_emb": jax.random.uniform(ks[1], (H,), jnp.float32, -s_emb, s_emb),
        "w_ih": jax.random.uniform(ks[2], (3 * H, I), jnp.float32, -s_gru, s_gru),
        "w_hh": jax.random.uniform(ks[3], (3 * H, H), jnp.float32, -s_gru, s_gru),
        "b_ih": jax.random.uniform(ks[4], (3 * H,), jnp.float32, -s_gru, s_gru),
        "b_hh": jax.random.uniform(ks[5], (3 * H,), jnp.float32, -s_gru, s_gru),
    }

    x = jax.random.normal(ks[6], (B, S, I), jnp.float32)
    hidden0 = jnp.zeros((1, B, H), jnp.float32)   # EncoderRNN.inithidden()

    ref_out, ref_hn = encoder_rnn_reference(params, x, hidden0)

    # f32-operand path (exact check). Weights packed ONCE, reused per call.
    packed_f32 = pack_encoder_params(params, compute_dtype=jnp.float32)
    out, hn = encoder_rnn_forward(packed_f32, x, hidden0, hidden_size=H)
    out = jax.block_until_ready(out)
    hn = jax.block_until_ready(hn)
    assert out.shape == (B, S, H) and hn.shape == (1, B, H)
    assert jnp.allclose(out, ref_out, atol=1e-4, rtol=1e-4), "output mismatch vs reference"
    assert jnp.allclose(hn, ref_hn, atol=1e-4, rtol=1e-4), "hidden mismatch vs reference"

    # bf16 matmul operands (MXU-native on v5e/v6e/v7x), f32 accumulation — loose check.
    packed_bf16 = pack_encoder_params(params, compute_dtype=jnp.bfloat16)
    out_bf, hn_bf = encoder_rnn_forward(packed_bf16, x, hidden0, hidden_size=H)
    out_bf = jax.block_until_ready(out_bf)
    hn_bf = jax.block_until_ready(hn_bf)
    assert jnp.allclose(out_bf, ref_out, atol=1e-1, rtol=1e-1), "bf16 path diverged"
    assert jnp.allclose(hn_bf, ref_hn, atol=1e-1, rtol=1e-1), "bf16 hidden diverged"

    print("KERNEL_OK")
</pallas_src>

<mosaic_0001>
module attributes {stable_mosaic.version = 11 : i64} {
  func.func @encoder_gru_kernel(%arg0: i32, %arg1: memref<128x128xf32, #tpu.memory_space<vmem>>, %arg2: memref<16x128xf32, #tpu.memory_space<vmem>>, %arg3: memref<128x128xf32, #tpu.memory_space<vmem>>, %arg4: memref<1x128xf32, #tpu.memory_space<vmem>>, %arg5: memref<128x384xf32, #tpu.memory_space<vmem>>, %arg6: memref<1x384xf32, #tpu.memory_space<vmem>>, %arg7: memref<128x384xf32, #tpu.memory_space<vmem>>, %arg8: memref<1x128xf32, #tpu.memory_space<vmem>>, %arg9: memref<8x16x128xf32, #tpu.memory_space<vmem>>, %arg10: memref<128x384xf32, #tpu.memory_space<vmem>>) attributes {dimension_semantics = [#tpu.dimension_semantics<arbitrary>], iteration_bounds = array<i64: 1>, scalar_prefetch = 0 : i64, scratch_operands = 1 : i64, tpu.core_type = #tpu.core_type<tc>, window_params = [{pipeline_mode = #tpu.pipeline_mode<synchronous>, transform_indices = @transform_0, window_bounds = array<i64: 128, 128>}, {pipeline_mode = #tpu.pipeline_mode<synchronous>, transform_indices = @transform_1, window_bounds = array<i64: 16, 128>}, {pipeline_mode = #tpu.pipeline_mode<synchronous>, transform_indices = @transform_2, window_bounds = array<i64: 128, 128>}, {pipeline_mode = #tpu.pipeline_mode<synchronous>, transform_indices = @transform_3, window_bounds = array<i64: 1, 128>}, {pipeline_mode = #tpu.pipeline_mode<synchronous>, transform_indices = @transform_4, window_bounds = array<i64: 128, 384>}, {pipeline_mode = #tpu.pipeline_mode<synchronous>, transform_indices = @transform_5, window_bounds = array<i64: 1, 384>}, {pipeline_mode = #tpu.pipeline_mode<synchronous>, transform_indices = @transform_6, window_bounds = array<i64: 128, 384>}, {pipeline_mode = #tpu.pipeline_mode<synchronous>, transform_indices = @transform_7, window_bounds = array<i64: 1, 128>}, {pipeline_mode = #tpu.pipeline_mode<synchronous>, transform_indices = @transform_8, window_bounds = array<i64: 8, 16, 128>}]} {
    %c0 = arith.constant 0 : index
    %c0_0 = arith.constant 0 : index
    %0 = vector.load %arg1[%c0, %c0_0] : memref<128x128xf32, #tpu.memory_space<vmem>>, vector<128x128xf32>
    %c0_1 = arith.constant 0 : index
    %c0_2 = arith.constant 0 : index
    %1 = vector.load %arg3[%c0_1, %c0_2] : memref<128x128xf32, #tpu.memory_space<vmem>>, vector<128x128xf32>
    %cst = arith.constant dense<0.000000e+00> : vector<128x128xf32>
    %2 = tpu.matmul %0, %1, %cst {dimension_numbers = #tpu.dot_dimension_numbers<[1], [0], [0], [1], [0, 0, 1, 1], [], []>} : vector<128x128xf32>, vector<128x128xf32>, vector<128x128xf32> -> vector<128x128xf32>
    %c0_3 = arith.constant 0 : index
    %c0_4 = arith.constant 0 : index
    %3 = vector.load %arg4[%c0_3, %c0_4] : memref<1x128xf32, #tpu.memory_space<vmem>>, vector<1x128xf32>
    %4 = vector.broadcast %3 : vector<1x128xf32> to vector<128x128xf32>
    %5 = arith.addf %2, %4 : vector<128x128xf32>
    %cst_5 = arith.constant 0.000000e+00 : f32
    %6 = vector.broadcast %cst_5 : f32 to vector<128x128xf32>
    %7 = arith.maximumf %5, %6 : vector<128x128xf32>
    %c0_6 = arith.constant 0 : index
    %c0_7 = arith.constant 0 : index
    %8 = vector.load %arg5[%c0_6, %c0_7] : memref<128x384xf32, #tpu.memory_space<vmem>>, vector<128x384xf32>
    %cst_8 = arith.constant dense<0.000000e+00> : vector<128x384xf32>
    %9 = tpu.matmul %7, %8, %cst_8 {dimension_numbers = #tpu.dot_dimension_numbers<[1], [0], [0], [1], [0, 0, 1, 1], [], []>} : vector<128x128xf32>, vector<128x384xf32>, vector<128x384xf32> -> vector<128x384xf32>
    %c0_9 = arith.constant 0 : index
    %c0_10 = arith.constant 0 : index
    %10 = vector.load %arg6[%c0_9, %c0_10] : memref<1x384xf32, #tpu.memory_space<vmem>>, vector<1x384xf32>
    %11 = vector.broadcast %10 : vector<1x384xf32> to vector<128x384xf32>
    %12 = arith.addf %9, %11 : vector<128x384xf32>
    %c0_11 = arith.constant 0 : index
    %c0_12 = arith.constant 0 : index
    %13 = vector.load %arg10[%c0_11, %c0_12] : memref<128x384xf32, #tpu.memory_space<vmem>>, vector<128x384xf32>
    tpu.vector_store %arg10[%c0_11, %c0_12], %12 {strides = array<i32>} : memref<128x384xf32, #tpu.memory_space<vmem>>, vector<128x384xf32>,
    %c0_13 = arith.constant 0 : index
    %c0_14 = arith.constant 0 : index
    %14 = vector.load %arg8[%c0_13, %c0_14] : memref<1x128xf32, #tpu.memory_space<vmem>>, vector<1x128xf32>
    %15 = vector.shape_cast %14 : vector<1x128xf32> to vector<1x128xf32>
    %16 = vector.broadcast %15 : vector<1x128xf32> to vector<16x128xf32>
    %c0_15 = arith.constant 0 : index
    %c0_16 = arith.constant 0 : index
    %17 = vector.load %arg2[%c0_15, %c0_16] : memref<16x128xf32, #tpu.memory_space<vmem>>, vector<16x128xf32>
    %c0_i32 = arith.constant 0 : i32
    %c16_i32 = arith.constant 16 : i32
    %18 = arith.muli %c0_i32, %c16_i32 : i32
    %19 = tpu.assume_multiple %18, 16 : i32
    %20 = arith.index_cast %19 : i32 to index
    %c0_17 = arith.constant 0 : index
    %21 = vector.load %arg10[%20, %c0_17] : memref<128x384xf32, #tpu.memory_space<vmem>>, vector<16x384xf32>
    %c0_18 = arith.constant 0 : index
    %c0_19 = arith.constant 0 : index
    %22 = vector.load %arg7[%c0_18, %c0_19] : memref<128x384xf32, #tpu.memory_space<vmem>>, vector<128x384xf32>
    %cst_20 = arith.constant dense<0.000000e+00> : vector<16x384xf32>
    %23 = tpu.matmul %17, %22, %cst_20 {dimension_numbers = #tpu.dot_dimension_numbers<[1], [0], [0], [1], [0, 0, 1, 1], [], []>} : vector<16x128xf32>, vector<128x384xf32>, vector<16x384xf32> -> vector<16x384xf32>
    %24 = vector.extract_strided_slice %21 {offsets = [0, 0], sizes = [16, 128], strides = [1, 1]} : vector<16x384xf32> to vector<16x128xf32>
    %25 = vector.extract_strided_slice %23 {offsets = [0, 0], sizes = [16, 128], strides = [1, 1]} : vector<16x384xf32> to vector<16x128xf32>
    %26 = arith.addf %24, %25 : vector<16x128xf32>
    %27 = arith.negf %26 : vector<16x128xf32>
    %28 = math.exp %27 : vector<16x128xf32>
    %cst_21 = arith.constant 1.000000e+00 : f32
    %29 = vector.broadcast %cst_21 : f32 to vector<16x128xf32>
    %30 = arith.addf %29, %28 : vector<16x128xf32>
    %31 = arith.divf %29, %30 : vector<16x128xf32>
    %32 = vector.extract_strided_slice %21 {offsets = [0, 128], sizes = [16, 128], strides = [1, 1]} : vector<16x384xf32> to vector<16x128xf32>
    %33 = vector.extract_strided_slice %23 {offsets = [0, 128], sizes = [16, 128], strides = [1, 1]} : vector<16x384xf32> to vector<16x128xf32>
    %34 = arith.addf %32, %33 : vector<16x128xf32>
    %35 = arith.negf %34 : vector<16x128xf32>
    %36 = math.exp %35 : vector<16x128xf32>
    %cst_22 = arith.constant 1.000000e+00 : f32
    %37 = vector.broadcast %cst_22 : f32 to vector<16x128xf32>
    %38 = arith.addf %37, %36 : vector<16x128xf32>
    %39 = arith.divf %37, %38 : vector<16x128xf32>
    %40 = vector.extract_strided_slice %21 {offsets = [0, 256], sizes = [16, 128], strides = [1, 1]} : vector<16x384xf32> to vector<16x128xf32>
    %41 = vector.extract_strided_slice %23 {offsets = [0, 256], sizes = [16, 128], strides = [1, 1]} : vector<16x384xf32> to vector<16x128xf32>
    %42 = arith.addf %41, %16 : vector<16x128xf32>
    %43 = arith.mulf %31, %42 : vector<16x128xf32>
    %44 = arith.addf %40, %43 : vector<16x128xf32>
    %45 = math.tanh %44 : vector<16x128xf32>
    %46 = arith.subf %17, %45 : vector<16x128xf32>
    %47 = arith.mulf %39, %46 : vector<16x128xf32>
    %48 = arith.addf %45, %47 : vector<16x128xf32>
    %49 = arith.index_cast %c0_i32 : i32 to index
    %c0_23 = arith.constant 0 : index
    %c0_24 = arith.constant 0 : index
    %50 = vector.load %arg9[%49, %c0_23, %c0_24] : memref<8x16x128xf32, #tpu.memory_space<vmem>>, vector<1x16x128xf32>
    %51 = vector.shape_cast %50 : vector<1x16x128xf32> to vector<16x128xf32>
    %52 = vector.shape_cast %48 : vector<16x128xf32> to vector<1x16x128xf32>
    tpu.vector_store %arg9[%49, %c0_23, %c0_24], %52 {strides = array<i32>} : memref<8x16x128xf32, #tpu.memory_space<vmem>>, vector<1x16x128xf32>,
    %c1_i32 = arith.constant 1 : i32
    %c16_i32_25 = arith.constant 16 : i32
    %53 = arith.muli %c1_i32, %c16_i32_25 : i32
    %54 = tpu.assume_multiple %53, 16 : i32
    %55 = arith.index_cast %54 : i32 to index
    %c0_26 = arith.constant 0 : index
    %56 = vector.load %arg10[%55, %c0_26] : memref<128x384xf32, #tpu.memory_space<vmem>>, vector<16x384xf32>
    %c0_27 = arith.constant 0 : index
    %c0_28 = arith.constant 0 : index
    %57 = vector.load %arg7[%c0_27, %c0_28] : memref<128x384xf32, #tpu.memory_space<vmem>>, vector<128x384xf32>
    %cst_29 = arith.constant dense<0.000000e+00> : vector<16x384xf32>
    %58 = tpu.matmul %48, %57, %cst_29 {dimension_numbers = #tpu.dot_dimension_numbers<[1], [0], [0], [1], [0, 0, 1, 1], [], []>} : vector<16x128xf32>, vector<128x384xf32>, vector<16x384xf32> -> vector<16x384xf32>
    %59 = vector.extract_strided_slice %56 {offsets = [0, 0], sizes = [16, 128], strides = [1, 1]} : vector<16x384xf32> to vector<16x128xf32>
    %60 = vector.extract_strided_slice %58 {offsets = [0, 0], sizes = [16, 128], strides = [1, 1]} : vector<16x384xf32> to vector<16x128xf32>
    %61 = arith.addf %59, %60 : vector<16x128xf32>
    %62 = arith.negf %61 : vector<16x128xf32>
    %63 = math.exp %62 : vector<16x128xf32>
    %cst_30 = arith.constant 1.000000e+00 : f32
    %64 = vector.broadcast %cst_30 : f32 to vector<16x128xf32>
    %65 = arith.addf %64, %63 : vector<16x128xf32>
    %66 = arith.divf %64, %65 : vector<16x128xf32>
    %67 = vector.extract_strided_slice %56 {offsets = [0, 128], sizes = [16, 128], strides = [1, 1]} : vector<16x384xf32> to vector<16x128xf32>
    %68 = vector.extract_strided_slice %58 {offsets = [0, 128], sizes = [16, 128], strides = [1, 1]} : vector<16x384xf32> to vector<16x128xf32>
    %69 = arith.addf %67, %68 : vector<16x128xf32>
    %70 = arith.negf %69 : vector<16x128xf32>
    %71 = math.exp %70 : vector<16x128xf32>
    %cst_31 = arith.constant 1.000000e+00 : f32
    %72 = vector.broadcast %cst_31 : f32 to vector<16x128xf32>
    %73 = arith.addf %72, %71 : vector<16x128xf32>
    %74 = arith.divf %72, %73 : vector<16x128xf32>
    %75 = vector.extract_strided_slice %56 {offsets = [0, 256], sizes = [16, 128], strides = [1, 1]} : vector<16x384xf32> to vector<16x128xf32>
    %76 = vector.extract_strided_slice %58 {offsets = [0, 256], sizes = [16, 128], strides = [1, 1]} : vector<16x384xf32> to vector<16x128xf32>
    %77 = arith.addf %76, %16 : vector<16x128xf32>
    %78 = arith.mulf %66, %77 : vector<16x128xf32>
    %79 = arith.addf %75, %78 : vector<16x128xf32>
    %80 = math.tanh %79 : vector<16x128xf32>
    %81 = arith.subf %48, %80 : vector<16x128xf32>
    %82 = arith.mulf %74, %81 : vector<16x128xf32>
    %83 = arith.addf %80, %82 : vector<16x128xf32>
    %84 = arith.index_cast %c1_i32 : i32 to index
    %c0_32 = arith.constant 0 : index
    %c0_33 = arith.constant 0 : index
    %85 = vector.load %arg9[%84, %c0_32, %c0_33] : memref<8x16x128xf32, #tpu.memory_space<vmem>>, vector<1x16x128xf32>
    %86 = vector.shape_cast %85 : vector<1x16x128xf32> to vector<16x128xf32>
    %87 = vector.shape_cast %83 : vector<16x128xf32> to vector<1x16x128xf32>
    tpu.vector_store %arg9[%84, %c0_32, %c0_33], %87 {strides = array<i32>} : memref<8x16x128xf32, #tpu.memory_space<vmem>>, vector<1x16x128xf32>,
    %c2_i32 = arith.constant 2 : i32
    %c16_i32_34 = arith.constant 16 : i32
    %88 = arith.muli %c2_i32, %c16_i32_34 : i32
    %89 = tpu.assume_multiple %88, 16 : i32
    %90 = arith.index_cast %89 : i32 to index
    %c0_35 = arith.constant 0 : index
    %91 = vector.load %arg10[%90, %c0_35] : memref<128x384xf32, #tpu.memory_space<vmem>>, vector<16x384xf32>
    %c0_36 = arith.constant 0 : index
    %c0_37 = arith.constant 0 : index
    %92 = vector.load %arg7[%c0_36, %c0_37] : memref<128x384xf32, #tpu.memory_space<vmem>>, vector<128x384xf32>
    %cst_38 = arith.constant dense<0.000000e+00> : vector<16x384xf32>
    %93 = tpu.matmul %83, %92, %cst_38 {dimension_numbers = #tpu.dot_dimension_numbers<[1], [0], [0], [1], [0, 0, 1, 1], [], []>} : vector<16x128xf32>, vector<128x384xf32>, vector<16x384xf32> -> vector<16x384xf32>
    %94 = vector.extract_strided_slice %91 {offsets = [0, 0], sizes = [16, 128], strides = [1, 1]} : vector<16x384xf32> to vector<16x128xf32>
    %95 = vector.extract_strided_slice %93 {offsets = [0, 0], sizes = [16, 128], strides = [1, 1]} : vector<16x384xf32> to vector<16x128xf32>
    %96 = arith.addf %94, %95 : vector<16x128xf32>
    %97 = arith.negf %96 : vector<16x128xf32>
    %98 = math.exp %97 : vector<16x128xf32>
    %cst_39 = arith.constant 1.000000e+00 : f32
    %99 = vector.broadcast %cst_39 : f32 to vector<16x128xf32>
    %100 = arith.addf %99, %98 : vector<16x128xf32>
    %101 = arith.divf %99, %100 : vector<16x128xf32>
    %102 = vector.extract_strided_slice %91 {offsets = [0, 128], sizes = [16, 128], strides = [1, 1]} : vector<16x384xf32> to vector<16x128xf32>
    %103 = vector.extract_strided_slice %93 {offsets = [0, 128], sizes = [16, 128], strides = [1, 1]} : vector<16x384xf32> to vector<16x128xf32>
    %104 = arith.addf %102, %103 : vector<16x128xf32>
    %105 = arith.negf %104 : vector<16x128xf32>
    %106 = math.exp %105 : vector<16x128xf32>
    %cst_40 = arith.constant 1.000000e+00 : f32
    %107 = vector.broadcast %cst_40 : f32 to vector<16x128xf32>
    %108 = arith.addf %107, %106 : vector<16x128xf32>
    %109 = arith.divf %107, %108 : vector<16x128xf32>
    %110 = vector.extract_strided_slice %91 {offsets = [0, 256], sizes = [16, 128], strides = [1, 1]} : vector<16x384xf32> to vector<16x128xf32>
    %111 = vector.extract_strided_slice %93 {offsets = [0, 256], sizes = [16, 128], strides = [1, 1]} : vector<16x384xf32> to vector<16x128xf32>
    %112 = arith.addf %111, %16 : vector<16x128xf32>
    %113 = arith.mulf %101, %112 : vector<16x128xf32>
    %114 = arith.addf %110, %113 : vector<16x128xf32>
    %115 = math.tanh %114 : vector<16x128xf32>
    %116 = arith.subf %83, %115 : vector<16x128xf32>
    %117 = arith.mulf %109, %116 : vector<16x128xf32>
    %118 = arith.addf %115, %117 : vector<16x128xf32>
    %119 = arith.index_cast %c2_i32 : i32 to index
    %c0_41 = arith.constant 0 : index
    %c0_42 = arith.constant 0 : index
    %120 = vector.load %arg9[%119, %c0_41, %c0_42] : memref<8x16x128xf32, #tpu.memory_space<vmem>>, vector<1x16x128xf32>
    %121 = vector.shape_cast %120 : vector<1x16x128xf32> to vector<16x128xf32>
    %122 = vector.shape_cast %118 : vector<16x128xf32> to vector<1x16x128xf32>
    tpu.vector_store %arg9[%119, %c0_41, %c0_42], %122 {strides = array<i32>} : memref<8x16x128xf32, #tpu.memory_space<vmem>>, vector<1x16x128xf32>,
    %c3_i32 = arith.constant 3 : i32
    %c16_i32_43 = arith.constant 16 : i32
    %123 = arith.muli %c3_i32, %c16_i32_43 : i32
    %124 = tpu.assume_multiple %123, 16 : i32
    %125 = arith.index_cast %124 : i32 to index
    %c0_44 = arith.constant 0 : index
    %126 = vector.load %arg10[%125, %c0_44] : memref<128x384xf32, #tpu.memory_space<vmem>>, vector<16x384xf32>
    %c0_45 = arith.constant 0 : index
    %c0_46 = arith.constant 0 : index
    %127 = vector.load %arg7[%c0_45, %c0_46] : memref<128x384xf32, #tpu.memory_space<vmem>>, vector<128x384xf32>
    %cst_47 = arith.constant dense<0.000000e+00> : vector<16x384xf32>
    %128 = tpu.matmul %118, %127, %cst_47 {dimension_numbers = #tpu.dot_dimension_numbers<[1], [0], [0], [1], [0, 0, 1, 1], [], []>} : vector<16x128xf32>, vector<128x384xf32>, vector<16x384xf32> -> vector<16x384xf32>
    %129 = vector.extract_strided_slice %126 {offsets = [0, 0], sizes = [16, 128], strides = [1, 1]} : vector<16x384xf32> to vector<16x128xf32>
    %130 = vector.extract_strided_slice %128 {offsets = [0, 0], sizes = [16, 128], strides = [1, 1]} : vector<16x384xf32> to vector<16x128xf32>
    %131 = arith.addf %129, %130 : vector<16x128xf32>
    %132 = arith.negf %131 : vector<16x128xf32>
    %133 = math.exp %132 : vector<16x128xf32>
    %cst_48 = arith.constant 1.000000e+00 : f32
    %134 = vector.broadcast %cst_48 : f32 to vector<16x128xf32>
    %135 = arith.addf %134, %133 : vector<16x128xf32>
    %136 = arith.divf %134, %135 : vector<16x128xf32>
    %137 = vector.extract_strided_slice %126 {offsets = [0, 128], sizes = [16, 128], strides = [1, 1]} : vector<16x384xf32> to vector<16x128xf32>
    %138 = vector.extract_strided_slice %128 {offsets = [0, 128], sizes = [16, 128], strides = [1, 1]} : vector<16x384xf32> to vector<16x128xf32>
    %139 = arith.addf %137, %138 : vector<16x128xf32>
    %140 = arith.negf %139 : vector<16x128xf32>
    %141 = math.exp %140 : vector<16x128xf32>
    %cst_49 = arith.constant 1.000000e+00 : f32
    %142 = vector.broadcast %cst_49 : f32 to vector<16x128xf32>
    %143 = arith.addf %142, %141 : vector<16x128xf32>
    %144 = arith.divf %142, %143 : vector<16x128xf32>
    %145 = vector.extract_strided_slice %126 {offsets = [0, 256], sizes = [16, 128], strides = [1, 1]} : vector<16x384xf32> to vector<16x128xf32>
    %146 = vector.extract_strided_slice %128 {offsets = [0, 256], sizes = [16, 128], strides = [1, 1]} : vector<16x384xf32> to vector<16x128xf32>
    %147 = arith.addf %146, %16 : vector<16x128xf32>
    %148 = arith.mulf %136, %147 : vector<16x128xf32>
    %149 = arith.addf %145, %148 : vector<16x128xf32>
    %150 = math.tanh %149 : vector<16x128xf32>
    %151 = arith.subf %118, %150 : vector<16x128xf32>
    %152 = arith.mulf %144, %151 : vector<16x128xf32>
    %153 = arith.addf %150, %152 : vector<16x128xf32>
    %154 = arith.index_cast %c3_i32 : i32 to index
    %c0_50 = arith.constant 0 : index
    %c0_51 = arith.constant 0 : index
    %155 = vector.load %arg9[%154, %c0_50, %c0_51] : memref<8x16x128xf32, #tpu.memory_space<vmem>>, vector<1x16x128xf32>
    %156 = vector.shape_cast %155 : vector<1x16x128xf32> to vector<16x128xf32>
    %157 = vector.shape_cast %153 : vector<16x128xf32> to vector<1x16x128xf32>
    tpu.vector_store %arg9[%154, %c0_50, %c0_51], %157 {strides = array<i32>} : memref<8x16x128xf32, #tpu.memory_space<vmem>>, vector<1x16x128xf32>,
    %c4_i32 = arith.constant 4 : i32
    %c16_i32_52 = arith.constant 16 : i32
    %158 = arith.muli %c4_i32, %c16_i32_52 : i32
    %159 = tpu.assume_multiple %158, 16 : i32
    %160 = arith.index_cast %159 : i32 to index
    %c0_53 = arith.constant 0 : index
    %161 = vector.load %arg10[%160, %c0_53] : memref<128x384xf32, #tpu.memory_space<vmem>>, vector<16x384xf32>
    %c0_54 = arith.constant 0 : index
    %c0_55 = arith.constant 0 : index
    %162 = vector.load %arg7[%c0_54, %c0_55] : memref<128x384xf32, #tpu.memory_space<vmem>>, vector<128x384xf32>
    %cst_56 = arith.constant dense<0.000000e+00> : vector<16x384xf32>
    %163 = tpu.matmul %153, %162, %cst_56 {dimension_numbers = #tpu.dot_dimension_numbers<[1], [0], [0], [1], [0, 0, 1, 1], [], []>} : vector<16x128xf32>, vector<128x384xf32>, vector<16x384xf32> -> vector<16x384xf32>
    %164 = vector.extract_strided_slice %161 {offsets = [0, 0], sizes = [16, 128], strides = [1, 1]} : vector<16x384xf32> to vector<16x128xf32>
    %165 = vector.extract_strided_slice %163 {offsets = [0, 0], sizes = [16, 128], strides = [1, 1]} : vector<16x384xf32> to vector<16x128xf32>
    %166 = arith.addf %164, %165 : vector<16x128xf32>
    %167 = arith.negf %166 : vector<16x128xf32>
    %168 = math.exp %167 : vector<16x128xf32>
    %cst_57 = arith.constant 1.000000e+00 : f32
    %169 = vector.broadcast %cst_57 : f32 to vector<16x128xf32>
    %170 = arith.addf %169, %168 : vector<16x128xf32>
    %171 = arith.divf %169, %170 : vector<16x128xf32>
    %172 = vector.extract_strided_slice %161 {offsets = [0, 128], sizes = [16, 128], strides = [1, 1]} : vector<16x384xf32> to vector<16x128xf32>
    %173 = vector.extract_strided_slice %163 {offsets = [0, 128], sizes = [16, 128], strides = [1, 1]} : vector<16x384xf32> to vector<16x128xf32>
    %174 = arith.addf %172, %173 : vector<16x128xf32>
    %175 = arith.negf %174 : vector<16x128xf32>
    %176 = math.exp %175 : vector<16x128xf32>
    %cst_58 = arith.constant 1.000000e+00 : f32
    %177 = vector.broadcast %cst_58 : f32 to vector<16x128xf32>
    %178 = arith.addf %177, %176 : vector<16x128xf32>
    %179 = arith.divf %177, %178 : vector<16x128xf32>
    %180 = vector.extract_strided_slice %161 {offsets = [0, 256], sizes = [16, 128], strides = [1, 1]} : vector<16x384xf32> to vector<16x128xf32>
    %181 = vector.extract_strided_slice %163 {offsets = [0, 256], sizes = [16, 128], strides = [1, 1]} : vector<16x384xf32> to vector<16x128xf32>
    %182 = arith.addf %181, %16 : vector<16x128xf32>
    %183 = arith.mulf %171, %182 : vector<16x128xf32>
    %184 = arith.addf %180, %183 : vector<16x128xf32>
    %185 = math.tanh %184 : vector<16x128xf32>
    %186 = arith.subf %153, %185 : vector<16x128xf32>
    %187 = arith.mulf %179, %186 : vector<16x128xf32>
    %188 = arith.addf %185, %187 : vector<16x128xf32>
    %189 = arith.index_cast %c4_i32 : i32 to index
    %c0_59 = arith.constant 0 : index
    %c0_60 = arith.constant 0 : index
    %190 = vector.load %arg9[%189, %c0_59, %c0_60] : memref<8x16x128xf32, #tpu.memory_space<vmem>>, vector<1x16x128xf32>
    %191 = vector.shape_cast %190 : vector<1x16x128xf32> to vector<16x128xf32>
    %192 = vector.shape_cast %188 : vector<16x128xf32> to vector<1x16x128xf32>
    tpu.vector_store %arg9[%189, %c0_59, %c0_60], %192 {strides = array<i32>} : memref<8x16x128xf32, #tpu.memory_space<vmem>>, vector<1x16x128xf32>,
    %c5_i32 = arith.constant 5 : i32
    %c16_i32_61 = arith.constant 16 : i32
    %193 = arith.muli %c5_i32, %c16_i32_61 : i32
    %194 = tpu.assume_multiple %193, 16 : i32
    %195 = arith.index_cast %194 : i32 to index
    %c0_62 = arith.constant 0 : index
    %196 = vector.load %arg10[%195, %c0_62] : memref<128x384xf32, #tpu.memory_space<vmem>>, vector<16x384xf32>
    %c0_63 = arith.constant 0 : index
    %c0_64 = arith.constant 0 : index
    %197 = vector.load %arg7[%c0_63, %c0_64] : memref<128x384xf32, #tpu.memory_space<vmem>>, vector<128x384xf32>
    %cst_65 = arith.constant dense<0.000000e+00> : vector<16x384xf32>
    %198 = tpu.matmul %188, %197, %cst_65 {dimension_numbers = #tpu.dot_dimension_numbers<[1], [0], [0], [1], [0, 0, 1, 1], [], []>} : vector<16x128xf32>, vector<128x384xf32>, vector<16x384xf32> -> vector<16x384xf32>
    %199 = vector.extract_strided_slice %196 {offsets = [0, 0], sizes = [16, 128], strides = [1, 1]} : vector<16x384xf32> to vector<16x128xf32>
    %200 = vector.extract_strided_slice %198 {offsets = [0, 0], sizes = [16, 128], strides = [1, 1]} : vector<16x384xf32> to vector<16x128xf32>
    %201 = arith.addf %199, %200 : vector<16x128xf32>
    %202 = arith.negf %201 : vector<16x128xf32>
    %203 = math.exp %202 : vector<16x128xf32>
    %cst_66 = arith.constant 1.000000e+00 : f32
    %204 = vector.broadcast %cst_66 : f32 to vector<16x128xf32>
    %205 = arith.addf %204, %203 : vector<16x128xf32>
    %206 = arith.divf %204, %205 : vector<16x128xf32>
    %207 = vector.extract_strided_slice %196 {offsets = [0, 128], sizes = [16, 128], strides = [1, 1]} : vector<16x384xf32> to vector<16x128xf32>
    %208 = vector.extract_strided_slice %198 {offsets = [0, 128], sizes = [16, 128], strides = [1, 1]} : vector<16x384xf32> to vector<16x128xf32>
    %209 = arith.addf %207, %208 : vector<16x128xf32>
    %210 = arith.negf %209 : vector<16x128xf32>
    %211 = math.exp %210 : vector<16x128xf32>
    %cst_67 = arith.constant 1.000000e+00 : f32
    %212 = vector.broadcast %cst_67 : f32 to vector<16x128xf32>
    %213 = arith.addf %212, %211 : vector<16x128xf32>
    %214 = arith.divf %212, %213 : vector<16x128xf32>
    %215 = vector.extract_strided_slice %196 {offsets = [0, 256], sizes = [16, 128], strides = [1, 1]} : vector<16x384xf32> to vector<16x128xf32>
    %216 = vector.extract_strided_slice %198 {offsets = [0, 256], sizes = [16, 128], strides = [1, 1]} : vector<16x384xf32> to vector<16x128xf32>
    %217 = arith.addf %216, %16 : vector<16x128xf32>
    %218 = arith.mulf %206, %217 : vector<16x128xf32>
    %219 = arith.addf %215, %218 : vector<16x128xf32>
    %220 = math.tanh %219 : vector<16x128xf32>
    %221 = arith.subf %188, %220 : vector<16x128xf32>
    %222 = arith.mulf %214, %221 : vector<16x128xf32>
    %223 = arith.addf %220, %222 : vector<16x128xf32>
    %224 = arith.index_cast %c5_i32 : i32 to index
    %c0_68 = arith.constant 0 : index
    %c0_69 = arith.constant 0 : index
    %225 = vector.load %arg9[%224, %c0_68, %c0_69] : memref<8x16x128xf32, #tpu.memory_space<vmem>>, vector<1x16x128xf32>
    %226 = vector.shape_cast %225 : vector<1x16x128xf32> to vector<16x128xf32>
    %227 = vector.shape_cast %223 : vector<16x128xf32> to vector<1x16x128xf32>
    tpu.vector_store %arg9[%224, %c0_68, %c0_69], %227 {strides = array<i32>} : memref<8x16x128xf32, #tpu.memory_space<vmem>>, vector<1x16x128xf32>,
    %c6_i32 = arith.constant 6 : i32
    %c16_i32_70 = arith.constant 16 : i32
    %228 = arith.muli %c6_i32, %c16_i32_70 : i32
    %229 = tpu.assume_multiple %228, 16 : i32
    %230 = arith.index_cast %229 : i32 to index
    %c0_71 = arith.constant 0 : index
    %231 = vector.load %arg10[%230, %c0_71] : memref<128x384xf32, #tpu.memory_space<vmem>>, vector<16x384xf32>
    %c0_72 = arith.constant 0 : index
    %c0_73 = arith.constant 0 : index
    %232 = vector.load %arg7[%c0_72, %c0_73] : memref<128x384xf32, #tpu.memory_space<vmem>>, vector<128x384xf32>
    %cst_74 = arith.constant dense<0.000000e+00> : vector<16x384xf32>
    %233 = tpu.matmul %223, %232, %cst_74 {dimension_numbers = #tpu.dot_dimension_numbers<[1], [0], [0], [1], [0, 0, 1, 1], [], []>} : vector<16x128xf32>, vector<128x384xf32>, vector<16x384xf32> -> vector<16x384xf32>
    %234 = vector.extract_strided_slice %231 {offsets = [0, 0], sizes = [16, 128], strides = [1, 1]} : vector<16x384xf32> to vector<16x128xf32>
    %235 = vector.extract_strided_slice %233 {offsets = [0, 0], sizes = [16, 128], strides = [1, 1]} : vector<16x384xf32> to vector<16x128xf32>
    %236 = arith.addf %234, %235 : vector<16x128xf32>
    %237 = arith.negf %236 : vector<16x128xf32>
    %238 = math.exp %237 : vector<16x128xf32>
    %cst_75 = arith.constant 1.000000e+00 : f32
    %239 = vector.broadcast %cst_75 : f32 to vector<16x128xf32>
    %240 = arith.addf %239, %238 : vector<16x128xf32>
    %241 = arith.divf %239, %240 : vector<16x128xf32>
    %242 = vector.extract_strided_slice %231 {offsets = [0, 128], sizes = [16, 128], strides = [1, 1]} : vector<16x384xf32> to vector<16x128xf32>
    %243 = vector.extract_strided_slice %233 {offsets = [0, 128], sizes = [16, 128], strides = [1, 1]} : vector<16x384xf32> to vector<16x128xf32>
    %244 = arith.addf %242, %243 : vector<16x128xf32>
    %245 = arith.negf %244 : vector<16x128xf32>
    %246 = math.exp %245 : vector<16x128xf32>
    %cst_76 = arith.constant 1.000000e+00 : f32
    %247 = vector.broadcast %cst_76 : f32 to vector<16x128xf32>
    %248 = arith.addf %247, %246 : vector<16x128xf32>
    %249 = arith.divf %247, %248 : vector<16x128xf32>
    %250 = vector.extract_strided_slice %231 {offsets = [0, 256], sizes = [16, 128], strides = [1, 1]} : vector<16x384xf32> to vector<16x128xf32>
    %251 = vector.extract_strided_slice %233 {offsets = [0, 256], sizes = [16, 128], strides = [1, 1]} : vector<16x384xf32> to vector<16x128xf32>
    %252 = arith.addf %251, %16 : vector<16x128xf32>
    %253 = arith.mulf %241, %252 : vector<16x128xf32>
    %254 = arith.addf %250, %253 : vector<16x128xf32>
    %255 = math.tanh %254 : vector<16x128xf32>
    %256 = arith.subf %223, %255 : vector<16x128xf32>
    %257 = arith.mulf %249, %256 : vector<16x128xf32>
    %258 = arith.addf %255, %257 : vector<16x128xf32>
    %259 = arith.index_cast %c6_i32 : i32 to index
    %c0_77 = arith.constant 0 : index
    %c0_78 = arith.constant 0 : index
    %260 = vector.load %arg9[%259, %c0_77, %c0_78] : memref<8x16x128xf32, #tpu.memory_space<vmem>>, vector<1x16x128xf32>
    %261 = vector.shape_cast %260 : vector<1x16x128xf32> to vector<16x128xf32>
    %262 = vector.shape_cast %258 : vector<16x128xf32> to vector<1x16x128xf32>
    tpu.vector_store %arg9[%259, %c0_77, %c0_78], %262 {strides = array<i32>} : memref<8x16x128xf32, #tpu.memory_space<vmem>>, vector<1x16x128xf32>,
    %c7_i32 = arith.constant 7 : i32
    %c16_i32_79 = arith.constant 16 : i32
    %263 = arith.muli %c7_i32, %c16_i32_79 : i32
    %264 = tpu.assume_multiple %263, 16 : i32
    %265 = arith.index_cast %264 : i32 to index
    %c0_80 = arith.constant 0 : index
    %266 = vector.load %arg10[%265, %c0_80] : memref<128x384xf32, #tpu.memory_space<vmem>>, vector<16x384xf32>
    %c0_81 = arith.constant 0 : index
    %c0_82 = arith.constant 0 : index
    %267 = vector.load %arg7[%c0_81, %c0_82] : memref<128x384xf32, #tpu.memory_space<vmem>>, vector<128x384xf32>
    %cst_83 = arith.constant dense<0.000000e+00> : vector<16x384xf32>
    %268 = tpu.matmul %258, %267, %cst_83 {dimension_numbers = #tpu.dot_dimension_numbers<[1], [0], [0], [1], [0, 0, 1, 1], [], []>} : vector<16x128xf32>, vector<128x384xf32>, vector<16x384xf32> -> vector<16x384xf32>
    %269 = vector.extract_strided_slice %266 {offsets = [0, 0], sizes = [16, 128], strides = [1, 1]} : vector<16x384xf32> to vector<16x128xf32>
    %270 = vector.extract_strided_slice %268 {offsets = [0, 0], sizes = [16, 128], strides = [1, 1]} : vector<16x384xf32> to vector<16x128xf32>
    %271 = arith.addf %269, %270 : vector<16x128xf32>
    %272 = arith.negf %271 : vector<16x128xf32>
    %273 = math.exp %272 : vector<16x128xf32>
    %cst_84 = arith.constant 1.000000e+00 : f32
    %274 = vector.broadcast %cst_84 : f32 to vector<16x128xf32>
    %275 = arith.addf %274, %273 : vector<16x128xf32>
    %276 = arith.divf %274, %275 : vector<16x128xf32>
    %277 = vector.extract_strided_slice %266 {offsets = [0, 128], sizes = [16, 128], strides = [1, 1]} : vector<16x384xf32> to vector<16x128xf32>
    %278 = vector.extract_strided_slice %268 {offsets = [0, 128], sizes = [16, 128], strides = [1, 1]} : vector<16x384xf32> to vector<16x128xf32>
    %279 = arith.addf %277, %278 : vector<16x128xf32>
    %280 = arith.negf %279 : vector<16x128xf32>
    %281 = math.exp %280 : vector<16x128xf32>
    %cst_85 = arith.constant 1.000000e+00 : f32
    %282 = vector.broadcast %cst_85 : f32 to vector<16x128xf32>
    %283 = arith.addf %282, %281 : vector<16x128xf32>
    %284 = arith.divf %282, %283 : vector<16x128xf32>
    %285 = vector.extract_strided_slice %266 {offsets = [0, 256], sizes = [16, 128], strides = [1, 1]} : vector<16x384xf32> to vector<16x128xf32>
    %286 = vector.extract_strided_slice %268 {offsets = [0, 256], sizes = [16, 128], strides = [1, 1]} : vector<16x384xf32> to vector<16x128xf32>
    %287 = arith.addf %286, %16 : vector<16x128xf32>
    %288 = arith.mulf %276, %287 : vector<16x128xf32>
    %289 = arith.addf %285, %288 : vector<16x128xf32>
    %290 = math.tanh %289 : vector<16x128xf32>
    %291 = arith.subf %258, %290 : vector<16x128xf32>
    %292 = arith.mulf %284, %291 : vector<16x128xf32>
    %293 = arith.addf %290, %292 : vector<16x128xf32>
    %294 = arith.index_cast %c7_i32 : i32 to index
    %c0_86 = arith.constant 0 : index
    %c0_87 = arith.constant 0 : index
    %295 = vector.load %arg9[%294, %c0_86, %c0_87] : memref<8x16x128xf32, #tpu.memory_space<vmem>>, vector<1x16x128xf32>
    %296 = vector.shape_cast %295 : vector<1x16x128xf32> to vector<16x128xf32>
    %297 = vector.shape_cast %293 : vector<16x128xf32> to vector<1x16x128xf32>
    tpu.vector_store %arg9[%294, %c0_86, %c0_87], %297 {strides = array<i32>} : memref<8x16x128xf32, #tpu.memory_space<vmem>>, vector<1x16x128xf32>,
    %c8_i32 = arith.constant 8 : i32
    return
  }
  func.func @transform_0(%arg0: i32) -> (i32, i32) {
    %c0_i32 = arith.constant 0 : i32
    %c0_i32_0 = arith.constant 0 : i32
    %c0_i32_1 = arith.constant 0 : i32
    return %c0_i32, %c0_i32_0 : i32, i32
  }
  func.func @transform_1(%arg0: i32) -> (i32, i32) {
    %c0_i32 = arith.constant 0 : i32
    %c0_i32_0 = arith.constant 0 : i32
    %c0_i32_1 = arith.constant 0 : i32
    return %c0_i32, %c0_i32_0 : i32, i32
  }
  func.func @transform_2(%arg0: i32) -> (i32, i32) {
    %c0_i32 = arith.constant 0 : i32
    %c0_i32_0 = arith.constant 0 : i32
    %c0_i32_1 = arith.constant 0 : i32
    return %c0_i32, %c0_i32_0 : i32, i32
  }
  func.func @transform_3(%arg0: i32) -> (i32, i32) {
    %c0_i32 = arith.constant 0 : i32
    %c0_i32_0 = arith.constant 0 : i32
    %c0_i32_1 = arith.constant 0 : i32
    return %c0_i32, %c0_i32_0 : i32, i32
  }
  func.func @transform_4(%arg0: i32) -> (i32, i32) {
    %c0_i32 = arith.constant 0 : i32
    %c0_i32_0 = arith.constant 0 : i32
    %c0_i32_1 = arith.constant 0 : i32
    return %c0_i32, %c0_i32_0 : i32, i32
  }
  func.func @transform_5(%arg0: i32) -> (i32, i32) {
    %c0_i32 = arith.constant 0 : i32
    %c0_i32_0 = arith.constant 0 : i32
    %c0_i32_1 = arith.constant 0 : i32
    return %c0_i32, %c0_i32_0 : i32, i32
  }
  func.func @transform_6(%arg0: i32) -> (i32, i32) {
    %c0_i32 = arith.constant 0 : i32
    %c0_i32_0 = arith.constant 0 : i32
    %c0_i32_1 = arith.constant 0 : i32
    return %c0_i32, %c0_i32_0 : i32, i32
  }
  func.func @transform_7(%arg0: i32) -> (i32, i32) {
    %c0_i32 = arith.constant 0 : i32
    %c0_i32_0 = arith.constant 0 : i32
    %c0_i32_1 = arith.constant 0 : i32
    return %c0_i32, %c0_i32_0 : i32, i32
  }
  func.func @transform_8(%arg0: i32) -> (i32, i32, i32) {
    %c0_i32 = arith.constant 0 : i32
    %c0_i32_0 = arith.constant 0 : i32
    %c0_i32_1 = arith.constant 0 : i32
    %c0_i32_2 = arith.constant 0 : i32
    return %c0_i32, %c0_i32_0, %c0_i32_1 : i32, i32, i32
  }
}

</mosaic_0001>

<bundles_post_ra>
// kernel: encoder_rnn_forward.1
= control target key start
LH: loop header
LB: loop body
LE: loop exit
PB: predicated region body
PF: predicated region fallthrough
CT: control target
= control target key end

     0   :  { %13 = vsyncpa [#allocation4], 0  ;;  %s4223_s27 = smov [#allocation3]   ;;  %s5235_s0 = inlined_call_operand.vmem [shape: f32[128,128], index: 0, kind: input, shape index: {}]   ;;  %s5236_s1 = inlined_call_operand.vmem [shape: f32[16,128], index: 1, kind: input, shape index: {}]   ;;  %s5237_s2 = inlined_call_operand.vmem [shape: f32[128,128], index: 2, kind: input, shape index: {}]   ;;  %s5238_s3 = inlined_call_operand.vmem [shape: f32[1,128], index: 3, kind: input, shape index: {}]   ;;  %s5239_s4 = inlined_call_operand.vmem [shape: f32[128,384], index: 4, kind: input, shape index: {}]   ;;  %s5240_s5 = inlined_call_operand.vmem [shape: f32[1,384], index: 5, kind: input, shape index: {}]   ;;  %s5241_s6 = inlined_call_operand.hbm [shape: f32[128,384], index: 6, kind: input, shape index: {}]   ;;  %s5242_s7 = inlined_call_operand.vmem [shape: f32[1,128], index: 7, kind: input, shape index: {}]   ;;  %s5243_s8 = inlined_call_operand.vmem [shape: f32[8,16,128], index: 8, kind: output, shape index: {}]  }
   0x1   :  { %s31_s28 = sshll.u32 %s4223_s27, 4  ;;  %s4199_s9 = scalar_lea.hbm %s5241_s6, 6144  ;;  %s32_s28 = int_to_ptr.vmem [resolvable:$true] %s31_s28 }
   0x2   :  { %p4200_p0 = scmp.ne.s32.totalorder %s5241_s6, %s4199_s9  ;;  %p4203_p1 = scmp.lt.u32.totalorder %s4199_s9, %s5241_s6 }
   0x4   :  { %p4205_p2 = pnand %p4203_p1, %p4200_p0 }
   0x6   :  { %4208 = shalt.err (!%p4205_p2)
}
   0x7   :  { %s4209_s14 = scalar_lea.vmem %s32_s28, 6144  ;;  %p4214_p4 = scmp.lt.s32.totalorder %s32_s28, %s32_s28 }
   0x8   :  { %p4210_p3 = scmp.ne.s32.totalorder %s32_s28, %s4209_s14  ;;  %p4215_p5 = scmp.lt.s32.totalorder %s4209_s14, %s4209_s14 }
   0xa   :  { %p4216_p6 = por %p4215_p5, %p4214_p4 }
   0xc   :  { %p4217_p7 = pnand %p4216_p6, %p4210_p3 }
   0xe   :  { %4220 = shalt.err (!%p4217_p7)
}
   0xf   :  { %s4224_s15 = smov 384   ;;  %s4225_s16 = smov 24  }
  0x10   :  { %37 = dma.hbm_to_vmem [thread:$0]  %s5241_s6, 6144, %s32_s28, [#allocation4], %s4224_s15, %s4224_s15, %s4225_s16  }
  0x11   :  { %4221 = dma.done.wait [#allocation4], 6144  }
  0x12   :  { %4222 = vsyncadd [#allocation4], 4294961152  ;;  %v59_v0 = vld [vmem:[%s5237_s2] sm:$0xff]  ;;  %v60_v1 = vld [vmem:[%s5237_s2 + $0x8] sm:$0xff] }
  0x13   :  { %v61_v2 = vld [vmem:[%s5237_s2 + $0x10] sm:$0xff]  ;;  %v3362_v3 = vpack.c.bf16 %v60_v1, %v59_v0  ;;  %v62_v4 = vld [vmem:[%s5237_s2 + $0x18] sm:$0xff]  ;;  %v63_v6 = vld [vmem:[%s5237_s2 + $0x20] sm:$0xff] }
  0x14   :  { %v3366_v5 = vpack.c.bf16 %v62_v4, %v61_v2  ;;  %v64_v7 = vld [vmem:[%s5237_s2 + $0x28] sm:$0xff]  ;;  %v43_v9 = vld [vmem:[%s5235_s0] sm:$0xff]  ;;  %v65_v10 = vld [vmem:[%s5237_s2 + $0x30] sm:$0xff] }
  0x15   :  { %3363 = vmatprep.subr.bf16.mxu0 %v3362_v3  ;;  %v3370_v8 = vpack.c.bf16 %v64_v7, %v63_v6  ;;  %v66_v11 = vld [vmem:[%s5237_s2 + $0x38] sm:$0xff]  ;;  %3002 = vmatprep.mubr.f32.mxu0 %v43_v9  ;;  %v67_v13 = vld [vmem:[%s5237_s2 + $0x40] sm:$0xff]  ;;  %v68_v14 = vld [vmem:[%s5237_s2 + $0x48] sm:$0xff] }
  0x16   :  { %3365 = vmatpush3.bf16.msra.mxu0 %v3362_v3  ;;  %v3374_v12 = vpack.c.bf16 %v66_v11, %v65_v10  ;;  %v244_v15 = vld [vmem:[%s5239_s4 + $0x8] sm:$0xff]  ;;  %v247_v16 = vld [vmem:[%s5239_s4 + $0x20] sm:$0xff]  ;;  %v246_v18 = vld [vmem:[%s5239_s4 + $0x18] sm:$0xff]  ;;  %v3378_v22 = vpack.c.bf16 %v68_v14, %v67_v13 }
  0x17   :  { %3367 = vmatprep.subr.bf16.mxu0 %v3366_v5  ;;  %v243_v17 = vld [vmem:[%s5239_s4] sm:$0xff]  ;;  %v3394_v19 = vpack.c.bf16 %v247_v16, %v244_v15  ;;  %v250_v21 = vld [vmem:[%s5239_s4 + $0x38] sm:$0xff]  ;;  %v253_v23 = vld [vmem:[%s5239_s4 + $0x50] sm:$0xff] }
  0x18   :  { %v3396_v20 = vpack.c.bf16 %v246_v18, %v243_v17  ;;  %v249_v24 = vld [vmem:[%s5239_s4 + $0x30] sm:$0xff]  ;;  %v252_v25 = vld [vmem:[%s5239_s4 + $0x48] sm:$0xff]  ;;  %v70_v27 = vld [vmem:[%s5237_s2 + $0x58] sm:$0xff]  ;;  %v3398_v28 = vpack.c.bf16 %v253_v23, %v250_v21 }
  0x19   :  { %v69_v26 = vld [vmem:[%s5237_s2 + $0x50] sm:$0xff]  ;;  %3395 = vmatprep.subr.bf16.mxu1 %v3394_v19  ;;  %v256_v29 = vld [vmem:[%s5239_s4 + $0x68] sm:$0xff]  ;;  %v3400_v30 = vpack.c.bf16 %v252_v25, %v249_v24  ;;  %v259_v31 = vld [vmem:[%s5239_s4 + $0x80] sm:$0xff] }
  0x1a   :  { %3369 = vmatpush3.bf16.msra.mxu0 %v3366_v5  ;;  %3397 = vmatpush1.bf16.msra.mxu1 %v3396_v20  ;;  %v3402_v32 = vpack.c.bf16 %v259_v31, %v256_v29  ;;  %v255_v33 = vld [vmem:[%s5239_s4 + $0x60] sm:$0xff]  ;;  %v258_v34 = vld [vmem:[%s5239_s4 + $0x78] sm:$0xff]  ;;  %v3382_v35 = vpack.c.bf16 %v70_v27, %v69_v26  ;;  %v265_v37 = vld [vmem:[%s5239_s4 + $0xb0] sm:$0xff] }
  0x1b   :  { %3371 = vmatprep.subr.bf16.mxu0 %v3370_v8  ;;  %3399 = vmatprep.subr.bf16.mxu1 %v3398_v28  ;;  %v262_v36 = vld [vmem:[%s5239_s4 + $0x98] sm:$0xff]  ;;  %v71_v38 = vld [vmem:[%s5237_s2 + $0x60] sm:$0xff]  ;;  %v72_v39 = vld [vmem:[%s5237_s2 + $0x68] sm:$0xff]  ;;  %v3404_v40 = vpack.c.bf16 %v258_v34, %v255_v33 }
  0x1c   :  { %v3406_v41 = vpack.c.bf16 %v265_v37, %v262_v36  ;;  %v261_v42 = vld [vmem:[%s5239_s4 + $0x90] sm:$0xff]  ;;  %v264_v43 = vld [vmem:[%s5239_s4 + $0xa8] sm:$0xff]  ;;  %v3386_v44 = vpack.c.bf16 %v72_v39, %v71_v38  ;;  %v271_v46 = vld [vmem:[%s5239_s4 + $0xe0] sm:$0xff] }
  0x1d   :  { %v268_v45 = vld [vmem:[%s5239_s4 + $0xc8] sm:$0xff]  ;;  %v73_v47 = vld [vmem:[%s5237_s2 + $0x70] sm:$0xff]  ;;  %v74_v48 = vld [vmem:[%s5237_s2 + $0x78] sm:$0xff]  ;;  %v3408_v49 = vpack.c.bf16 %v264_v43, %v261_v42 }
  0x1e   :  { %3373 = vmatpush3.bf16.msra.mxu0 %v3370_v8  ;;  %3401 = vmatpush1.bf16.msra.mxu1 %v3400_v30  ;;  %v3410_v50 = vpack.c.bf16 %v271_v46, %v268_v45  ;;  %v267_v51 = vld [vmem:[%s5239_s4 + $0xc0] sm:$0xff]  ;;  %v270_v52 = vld [vmem:[%s5239_s4 + $0xd8] sm:$0xff]  ;;  %v3390_v53 = vpack.c.bf16 %v74_v48, %v73_v47  ;;  %v277_v55 = vld [vmem:[%s5239_s4 + $0x110] sm:$0xff]  ;;  %v4226_v48 = vmov 0.0  }
  0x1f   :  { %3375 = vmatprep.subr.bf16.mxu0 %v3374_v12  ;;  %3403 = vmatprep.subr.bf16.mxu1 %v3402_v32  ;;  %v274_v54 = vld [vmem:[%s5239_s4 + $0xf8] sm:$0xff]  ;;  %v245_v56 = vld [vmem:[%s5239_s4 + $0x10] sm:$0xff]  ;;  %v248_v57 = vld [vmem:[%s5239_s4 + $0x28] sm:$0xff]  ;;  %v3412_v58 = vpack.c.bf16 %v270_v52, %v267_v51 }
  0x20   :  { %v3414_v59 = vpack.c.bf16 %v277_v55, %v274_v54  ;;  %v273_v60 = vld [vmem:[%s5239_s4 + $0xf0] sm:$0xff]  ;;  %v276_v61 = vld [vmem:[%s5239_s4 + $0x108] sm:$0xff]  ;;  %v3426_v62 = vpack.c.bf16 %v248_v57, %v245_v56  ;;  %v251_v63 = vld [vmem:[%s5239_s4 + $0x40] sm:$0xff]  ;;  %372 = vmatprep.mubr.f32.mxu1 %v4226_v48 }
  0x21   :  { %v254_v0 = vld [vmem:[%s5239_s4 + $0x58] sm:$0xff]  ;;  %v280_v1 = vld [vmem:[%s5239_s4 + $0x128] sm:$0xff]  ;;  %v283_v2 = vld [vmem:[%s5239_s4 + $0x140] sm:$0xff]  ;;  %v3416_v3 = vpack.c.bf16 %v276_v61, %v273_v60 }
  0x22   :  { %3377 = vmatpush3.bf16.msra.mxu0 %v3374_v12  ;;  %3405 = vmatpush1.bf16.msra.mxu1 %v3404_v40  ;;  %v44_v4 = vld [vmem:[%s5235_s0 + $0x8] sm:$0xff]  ;;  %v279_v5 = vld [vmem:[%s5239_s4 + $0x120] sm:$0xff]  ;;  %v282_v6 = vld [vmem:[%s5239_s4 + $0x138] sm:$0xff]  ;;  %v3430_v8 = vpack.c.bf16 %v254_v0, %v251_v63  ;;  %v3418_v9 = vpack.c.bf16 %v283_v2, %v280_v1 }
  0x23   :  { %3379 = vmatprep.subr.bf16.mxu0 %v3378_v22  ;;  %3407 = vmatprep.subr.bf16.mxu1 %v3406_v41  ;;  %v45_v7 = vld [vmem:[%s5235_s0 + $0x10] sm:$0xff]  ;;  %v260_v11 = vld [vmem:[%s5239_s4 + $0x88] sm:$0xff]  ;;  %v3420_v12 = vpack.c.bf16 %v282_v6, %v279_v5  ;;  %v46_v13 = vld [vmem:[%s5235_s0 + $0x18] sm:$0xff] }
  0x24   :  { %v257_v10 = vld [vmem:[%s5239_s4 + $0x70] sm:$0xff]  ;;  %v47_v14 = vld [vmem:[%s5235_s0 + $0x20] sm:$0xff]  ;;  %v266_v17 = vld [vmem:[%s5239_s4 + $0xb8] sm:$0xff] }
  0x25   :  { %v3434_v15 = vpack.c.bf16 %v260_v11, %v257_v10  ;;  %v263_v16 = vld [vmem:[%s5239_s4 + $0xa0] sm:$0xff]  ;;  %v48_v18 = vld [vmem:[%s5235_s0 + $0x28] sm:$0xff]  ;;  %v49_v19 = vld [vmem:[%s5235_s0 + $0x30] sm:$0xff] }
  0x26   :  { %3381 = vmatpush3.bf16.msra.mxu0 %v3378_v22  ;;  %3409 = vmatpush1.bf16.msra.mxu1 %v3408_v49  ;;  %v3438_v20 = vpack.c.bf16 %v266_v17, %v263_v16  ;;  %v269_v21 = vld [vmem:[%s5239_s4 + $0xd0] sm:$0xff]  ;;  %v272_v22 = vld [vmem:[%s5239_s4 + $0xe8] sm:$0xff]  ;;  %v50_v23 = vld [vmem:[%s5235_s0 + $0x38] sm:$0xff] }
  0x27   :  { %3383 = vmatprep.subr.bf16.mxu0 %v3382_v35  ;;  %3411 = vmatprep.subr.bf16.mxu1 %v3410_v50  ;;  %v51_v24 = vld [vmem:[%s5235_s0 + $0x40] sm:$0xff]  ;;  %v3442_v25 = vpack.c.bf16 %v272_v22, %v269_v21  ;;  %v278_v27 = vld [vmem:[%s5239_s4 + $0x118] sm:$0xff]  ;;  %v52_v28 = vld [vmem:[%s5235_s0 + $0x48] sm:$0xff] }
  0x28   :  { %v275_v26 = vld [vmem:[%s5239_s4 + $0x100] sm:$0xff]  ;;  %v53_v29 = vld [vmem:[%s5235_s0 + $0x50] sm:$0xff]  ;;  %v284_v32 = vld [vmem:[%s5239_s4 + $0x148] sm:$0xff] }
  0x29   :  { %v3446_v30 = vpack.c.bf16 %v278_v27, %v275_v26  ;;  %v281_v31 = vld [vmem:[%s5239_s4 + $0x130] sm:$0xff]  ;;  %v54_v33 = vld [vmem:[%s5235_s0 + $0x58] sm:$0xff]  ;;  %v55_v34 = vld [vmem:[%s5235_s0 + $0x60] sm:$0xff] }
  0x2a   :  { %3385 = vmatpush3.bf16.msra.mxu0 %v3382_v35  ;;  %3413 = vmatpush1.bf16.msra.mxu1 %v3412_v58  ;;  %v3450_v35 = vpack.c.bf16 %v284_v32, %v281_v31  ;;  %v56_v36 = vld [vmem:[%s5235_s0 + $0x68] sm:$0xff]  ;;  %v57_v37 = vld [vmem:[%s5235_s0 + $0x70] sm:$0xff]  ;;  %v58_v38 = vld [vmem:[%s5235_s0 + $0x78] sm:$0xff] }
  0x2b   :  { %3387 = vmatprep.subr.bf16.mxu0 %v3386_v44  ;;  %3415 = vmatprep.subr.bf16.mxu1 %v3414_v59  ;;  %v286_v39 = vld [vmem:[%s5239_s4 + $0x158] sm:$0xff]  ;;  %v289_v40 = vld [vmem:[%s5239_s4 + $0x170] sm:$0xff]  ;;  %v288_v43 = vld [vmem:[%s5239_s4 + $0x168] sm:$0xff] }
  0x2c   :  { %v3422_v41 = vpack.c.bf16 %v289_v40, %v286_v39  ;;  %v285_v42 = vld [vmem:[%s5239_s4 + $0x150] sm:$0xff]  ;;  %v287_v45 = vld [vmem:[%s5239_s4 + $0x160] sm:$0xff]  ;;  %v290_v46 = vld [vmem:[%s5239_s4 + $0x178] sm:$0xff] }
  0x2d   :  { %v3454_v47 = vpack.c.bf16 %v290_v46, %v287_v45  ;;  %v681_v49 = vld [vmem:[#allocation3 + $0x8] sm:$0xff]  ;;  %v684_v50 = vld [vmem:[#allocation3 + $0x20] sm:$0xff]  ;;  %v682_v52 = vld [vmem:[#allocation3 + $0x10] sm:$0xff] }
  0x2e   :  { %3389 = vmatpush3.bf16.msra.mxu0 %v3386_v44  ;;  %3417 = vmatpush1.bf16.msra.mxu1 %v3416_v3  ;;  %v3424_v44 = vpack.c.bf16 %v288_v43, %v285_v42  ;;  %v4525_v51 = vpack.c.bf16 %v684_v50, %v681_v49  ;;  %v4534_v55 = vld [vmem:[%s5238_s3] ss:$0 sm:$0xff]  ;;  %v683_v58 = vld [vmem:[#allocation3 + $0x18] sm:$0xff]  ;;  %v705_v42 = vld [vmem:[#allocation3 + $0xc8] sm:$0xff] }
  0x2f   :  { %3391 = vmatprep.subr.bf16.mxu0 %v3390_v53  ;;  %3419 = vmatprep.subr.bf16.mxu1 %v3418_v9  ;;  %v680_v57 = vld [vmem:[#allocation3] sm:$0xff]  ;;  %v687_v61 = vld [vmem:[#allocation3 + $0x38] sm:$0xff] }
  0x30   :  { %v4538_v0 = vpack.c.bf16 %v683_v58, %v680_v57  ;;  %v688_v9 = vld [vmem:[#allocation3 + $0x40] sm:$0xff]  ;;  %v691_v10 = vld [vmem:[#allocation3 + $0x58] sm:$0xff]  ;;  %v706_v58 = vld [vmem:[#allocation3 + $0xd0] sm:$0xff] }
  0x31   :  { %v699_v27 = vld [vmem:[#allocation3 + $0x98] sm:$0xff]  ;;  %v700_v39 = vld [vmem:[#allocation3 + $0xa0] sm:$0xff] }
  0x32   :  { %3393 = vmatpush3.bf16.msra.mxu0 %v3390_v53  ;;  %3421 = vmatpush1.bf16.msra.mxu1 %v3420_v12  ;;  %v685_v53 = vld [vmem:[#allocation3 + $0x28] sm:$0xff]  ;;  %v703_v40 = vld [vmem:[#allocation3 + $0xb8] sm:$0xff]  ;;  %v708_v43 = vld [vmem:[#allocation3 + $0xe0] sm:$0xff] }
  0x33   :  { %3427 = vmatprep.subr.bf16.mxu0 %v3426_v62  ;;  %3423 = vmatprep.subr.bf16.mxu1 %v3422_v41  ;;  %v4528_v54 = vpack.c.bf16 %v685_v53, %v682_v52  ;;  %v693_v12 = vld [vmem:[#allocation3 + $0x68] sm:$0xff]  ;;  %v704_v49 = vld [vmem:[#allocation3 + $0xc0] sm:$0xff]  ;;  %v4591_v50 = vpack.c.bf16 %v703_v40, %v700_v39  ;;  %v707_v57 = vld [vmem:[#allocation3 + $0xd8] sm:$0xff] }
  0x34   :  { %v726_v39 = vld [vmem:[#allocation3 + $0x170] sm:$0xff] }
  0x35   :  { %3003 = vmatmul.mubr.f32.vlgmr.msra.gmra.mrb[0].mxu0 %v44_v4  ;;  %v686_v4 = vld [vmem:[#allocation3 + $0x30] sm:$0xff] }
  0x36   :  { %3005 = vmatprep.mubr.f32.mxu0 %v45_v7  ;;  %3429 = vmatpush3.bf16.msra.mxu0 %v3426_v62  ;;  %v690_v62 = vld [vmem:[#allocation3 + $0x50] sm:$0xff] }
  0x37   :  { %3431 = vmatprep.subr.bf16.mxu0 %v3430_v8  ;;  %3425 = vmatpush1.bf16.msra.mxu1 %v3424_v44  ;;  %v4540_v3 = vpack.c.bf16 %v690_v62, %v687_v61  ;;  %v711_v61 = vld [vmem:[#allocation3 + $0xf8] sm:$0xff]  ;;  %v714_v62 = vld [vmem:[#allocation3 + $0x110] sm:$0xff] }
  0x38   :  { %3459 = vmatprep.subr.bf16.mxu1 %v4525_v51 }
  0x39   :  { %3006 = vmatmul.mubr.f32.gmra.mrb[2].mxu0 %v46_v13  ;;  %v696_v13 = vld [vmem:[#allocation3 + $0x80] sm:$0xff] }
  0x3a   :  { %3008 = vmatprep.mubr.f32.mxu0 %v47_v14  ;;  %3433 = vmatpush3.bf16.msra.mxu0 %v3430_v8  ;;  %v689_v8 = vld [vmem:[#allocation3 + $0x48] sm:$0xff]  ;;  %v4557_v22 = vpack.c.bf16 %v696_v13, %v693_v12  ;;  %v715_v12 = vld [vmem:[#allocation3 + $0x118] sm:$0xff] }
  0x3b   :  { %3435 = vmatprep.subr.bf16.mxu0 %v3434_v15  ;;  %v4550_v17 = vpack.c.bf16 %v689_v8, %v686_v4  ;;  %v4611_v4 = vpack.c.bf16 %v707_v57, %v704_v49 }
  0x3d   :  { %3009 = vmatmul.mubr.f32.gmra.mrb[4].mxu0 %v48_v18  ;;  %v692_v18 = vld [vmem:[#allocation3 + $0x60] sm:$0xff] }
  0x3e   :  { %3011 = vmatprep.mubr.f32.mxu0 %v49_v19  ;;  %3437 = vmatpush3.bf16.msra.mxu0 %v3434_v15  ;;  %v4552_v19 = vpack.c.bf16 %v691_v10, %v688_v9  ;;  %v4620_v9 = vpack.c.bf16 %v714_v62, %v711_v61  ;;  %v713_v10 = vld [vmem:[#allocation3 + $0x108] sm:$0xff]  ;;  %v727_v61 = vld [vmem:[#allocation3 + $0x178] sm:$0xff] }
  0x3f   :  { %3439 = vmatprep.subr.bf16.mxu0 %v3438_v20 }
  0x41   :  { %3012 = vmatmul.mubr.f32.gmra.mrb[6].mxu0 %v50_v23  ;;  %v695_v23 = vld [vmem:[#allocation3 + $0x78] sm:$0xff] }
  0x42   :  { %3014 = vmatprep.mubr.f32.mxu0 %v51_v24  ;;  %3441 = vmatpush3.bf16.msra.mxu0 %v3438_v20  ;;  %v694_v24 = vld [vmem:[#allocation3 + $0x70] sm:$0xff]  ;;  %v4567_v32 = vpack.c.bf16 %v695_v23, %v692_v18 }
  0x43   :  { %3443 = vmatprep.subr.bf16.mxu0 %v3442_v25 }
  0x45   :  { %3015 = vmatmul.mubr.f32.gmra.mrb[8].mxu0 %v52_v28  ;;  %v702_v28 = vld [vmem:[#allocation3 + $0xb0] sm:$0xff] }
  0x46   :  { %3017 = vmatprep.mubr.f32.mxu0 %v53_v29  ;;  %3445 = vmatpush3.bf16.msra.mxu0 %v3442_v25  ;;  %v697_v25 = vld [vmem:[#allocation3 + $0x88] sm:$0xff] }
  0x47   :  { %3447 = vmatprep.subr.bf16.mxu0 %v3446_v30 }
  0x49   :  { %3018 = vmatmul.mubr.f32.gmra.mrb[10].mxu0 %v54_v33  ;;  %v698_v33 = vld [vmem:[#allocation3 + $0x90] sm:$0xff] }
  0x4a   :  { %3020 = vmatprep.mubr.f32.mxu0 %v55_v34  ;;  %3449 = vmatpush3.bf16.msra.mxu0 %v3446_v30  ;;  %v4570_v34 = vpack.c.bf16 %v697_v25, %v694_v24  ;;  %v716_v24 = vld [vmem:[#allocation3 + $0x120] sm:$0xff] }
  0x4b   :  { %3451 = vmatprep.subr.bf16.mxu0 %v3450_v35 }
  0x4d   :  { %3021 = vmatmul.mubr.f32.gmra.mrb[12].mxu0 %v56_v36 }
  0x4e   :  { %3023 = vmatprep.mubr.f32.mxu0 %v57_v37  ;;  %3453 = vmatpush3.bf16.msra.mxu0 %v3450_v35  ;;  %v4576_v37 = vpack.c.bf16 %v702_v28, %v699_v27 }
  0x4f   :  { %3455 = vmatprep.subr.bf16.mxu0 %v3454_v47 }
  0x51   :  { %3024 = vmatmul.mubr.f32.gmra.mrb[14].mxu0 %v58_v38  ;;  %v701_v38 = vld [vmem:[#allocation3 + $0xa8] sm:$0xff] }
  0x52   :  { %3457 = vmatpush3.bf16.msra.mxu0 %v3454_v47  ;;  %v4588_v47 = vpack.c.bf16 %v701_v38, %v698_v33  ;;  %v721_v33 = vld [vmem:[#allocation3 + $0x148] sm:$0xff]  ;;  %v723_v38 = vld [vmem:[#allocation3 + $0x158] sm:$0xff] }
  0x53   :  { %3491 = vmatprep.subr.bf16.mxu0 %v4528_v54  ;;  %v4663_v57 = vpack.c.bf16 %v726_v39, %v723_v38 }
 0x108   :  { %v3004_v56 = vpop.f32.mrb[0].mxu0 }
 0x109   :  { %v154_v59 = vadd.f32 %v3004_v56, %v4534_v55  ;;  %v148_v60 = vpop.f32.mrb[1].mxu0  ;;  %v4597_v56 = vpack.c.bf16 %v708_v43, %v705_v42 }
 0x10a   :  { %v149_v63 = vadd.f32 %v4534_v55, %v148_v60 }
 0x10b   :  { %v228_v5 = vmax.f32 %v154_v59, 0.0  ;;  %v709_v59 = vld [vmem:[#allocation3 + $0xe8] sm:$0xff] }
 0x10c   :  { %v227_v1 = vmax.f32 %v149_v63, 0.0  ;;  %v3007_v2 = vpop.f32.mrb[2].mxu0 }
 0x10d   :  { %v4543_v6 = vadd.f32 %v3007_v2, %v4534_v55  ;;  %v158_v7 = vpop.f32.mrb[3].mxu0 }
 0x10e   :  { %v159_v11 = vadd.f32 %v4534_v55, %v158_v7  ;;  %373 = vmatmul.mubr.f32.vlgmr.msra.gmra.mrb[0].mxu1 %v227_v1  ;;  %3058 = vmatprep.mubr.f32.mxu0 %v227_v1 }
 0x10f   :  { %v230_v14 = vmax.f32 %v4543_v6, 0.0  ;;  %3461 = vmatpush1.bf16.msra.mxu1 %v4538_v0  ;;  %3059 = vmatmul.mubr.f32.vlgmr.msra.gmra.mrb[16].mxu0 %v228_v5  ;;  %v4614_v6 = vpack.c.bf16 %v709_v59, %v706_v58  ;;  %v725_v58 = vld [vmem:[#allocation3 + $0x168] sm:$0xff]  ;;  %v724_v59 = vld [vmem:[#allocation3 + $0x160] sm:$0xff] }
 0x110   :  { %v229_v15 = vmax.f32 %v159_v11, 0.0  ;;  %378 = vmatprep.mubr.f32.mxu1 %v4226_v48  ;;  %v3010_v16 = vpop.f32.mrb[4].mxu0  ;;  %3463 = vmatprep.subr.bf16.mxu1 %v4540_v3  ;;  %v712_v11 = vld [vmem:[#allocation3 + $0x100] sm:$0xff] }
 0x111   :  { %v4555_v20 = vadd.f32 %v3010_v16, %v4534_v55  ;;  %v168_v21 = vpop.f32.mrb[5].mxu0  ;;  %3493 = vmatpush3.bf16.msra.mxu0 %v4528_v54  ;;  %v4637_v25 = vpack.c.bf16 %v715_v12, %v712_v11 }
 0x112   :  { %379 = vmatmul.mubr.f32.gmra.mrb[2].mxu1 %v228_v5  ;;  %3061 = vmatprep.mubr.f32.mxu0 %v229_v15  ;;  %v4561_v26 = vadd.f32 %v4534_v55, %v168_v21  ;;  %v710_v5 = vld [vmem:[#allocation3 + $0xf0] sm:$0xff] }
 0x113   :  { %3062 = vmatmul.mubr.f32.gmra.mrb[18].mxu0 %v230_v14  ;;  %v232_v29 = vmax.f32 %v4555_v20, 0.0  ;;  %384 = vmatprep.mubr.f32.mxu1 %v4226_v48  ;;  %v4634_v23 = vpack.c.bf16 %v713_v10, %v710_v5  ;;  %v4674_v10 = vpack.c.bf16 %v727_v61, %v724_v59 }
 0x114   :  { %v231_v30 = vmax.f32 %v4561_v26, 0.0  ;;  %3465 = vmatpush1.bf16.msra.mxu1 %v4550_v17  ;;  %v3013_v31 = vpop.f32.mrb[6].mxu0  ;;  %3495 = vmatprep.subr.bf16.mxu0 %v4552_v19 }
 0x115   :  { %v4573_v35 = vadd.f32 %v3013_v31, %v4534_v55  ;;  %3467 = vmatprep.subr.bf16.mxu1 %v4557_v22  ;;  %v178_v36 = vpop.f32.mrb[7].mxu0  ;;  %3497 = vmatpush3.bf16.msra.mxu0 %v4552_v19  ;;  %v718_v31 = vld [vmem:[#allocation3 + $0x130] sm:$0xff] }
 0x116   :  { %385 = vmatmul.mubr.f32.gmra.mrb[4].mxu1 %v229_v15  ;;  %3064 = vmatprep.mubr.f32.mxu0 %v231_v30  ;;  %v4580_v41 = vadd.f32 %v4534_v55, %v178_v36  ;;  %v720_v15 = vld [vmem:[#allocation3 + $0x140] sm:$0xff] }
 0x117   :  { %390 = vmatprep.mubr.f32.mxu1 %v4226_v48  ;;  %3065 = vmatmul.mubr.f32.gmra.mrb[20].mxu0 %v232_v29  ;;  %v234_v44 = vmax.f32 %v4573_v35, 0.0  ;;  %v4697_v35 = vld [vmem:[%s5236_s1 + $0x8] sm:$0xff] }
 0x118   :  { %v233_v45 = vmax.f32 %v4580_v41, 0.0  ;;  %3469 = vmatpush1.bf16.msra.mxu1 %v4567_v32  ;;  %v3016_v46 = vpop.f32.mrb[8].mxu0  ;;  %3499 = vmatprep.subr.bf16.mxu0 %v4570_v34  ;;  %v293_v41 = vlaneseq }
 0x119   :  { %v4594_v52 = vadd.f32 %v3016_v46, %v4534_v55  ;;  %3471 = vmatprep.subr.bf16.mxu1 %v4576_v37  ;;  %v188_v53 = vpop.f32.mrb[9].mxu0  ;;  %3501 = vmatpush3.bf16.msra.mxu0 %v4570_v34  ;;  %v4659_v46 = vpack.c.bf16 %v721_v33, %v718_v31 }
 0x11a   :  { %391 = vmatmul.mubr.f32.gmra.mrb[6].mxu1 %v230_v14  ;;  %3067 = vmatprep.mubr.f32.mxu0 %v233_v45  ;;  %v4603_v60 = vadd.f32 %v4534_v55, %v188_v53  ;;  %v717_v14 = vld [vmem:[#allocation3 + $0x128] sm:$0xff] }
 0x11b   :  { %396 = vmatprep.mubr.f32.mxu1 %v4226_v48  ;;  %3068 = vmatmul.mubr.f32.gmra.mrb[22].mxu0 %v234_v44  ;;  %v236_v63 = vmax.f32 %v4594_v52, 0.0  ;;  %v4643_v28 = vpack.c.bf16 %v720_v15, %v717_v14  ;;  %v291_v52 = vld [vmem:[%s5240_s5] sm:$0x7] }
 0x11c   :  { %v235_v1 = vmax.f32 %v4603_v60, 0.0  ;;  %3473 = vmatpush1.bf16.msra.mxu1 %v4588_v47  ;;  %v3019_v2 = vpop.f32.mrb[10].mxu0  ;;  %3503 = vmatprep.subr.bf16.mxu0 %v4591_v50 }
 0x11d   :  { %v4617_v7 = vadd.f32 %v3019_v2, %v4534_v55  ;;  %3475 = vmatprep.subr.bf16.mxu1 %v4597_v56  ;;  %v198_v8 = vpop.f32.mrb[11].mxu0  ;;  %3505 = vmatpush3.bf16.msra.mxu0 %v4591_v50 }
 0x11e   :  { %397 = vmatmul.mubr.f32.gmra.mrb[8].mxu1 %v231_v30  ;;  %3070 = vmatprep.mubr.f32.mxu0 %v235_v1  ;;  %v4626_v13 = vadd.f32 %v4534_v55, %v198_v8  ;;  %v719_v30 = vld [vmem:[#allocation3 + $0x138] sm:$0xff] }
 0x11f   :  { %402 = vmatprep.mubr.f32.mxu1 %v4226_v48  ;;  %3071 = vmatmul.mubr.f32.gmra.mrb[24].mxu0 %v236_v63  ;;  %v238_v16 = vmax.f32 %v4617_v7, 0.0  ;;  %v4656_v20 = vpack.c.bf16 %v719_v30, %v716_v24 }
 0x120   :  { %v237_v18 = vmax.f32 %v4626_v13, 0.0  ;;  %3477 = vmatpush1.bf16.msra.mxu1 %v4611_v4  ;;  %v3022_v21 = vpop.f32.mrb[12].mxu0  ;;  %3507 = vmatprep.subr.bf16.mxu0 %v4614_v6 }
 0x121   :  { %v4640_v26 = vadd.f32 %v3022_v21, %v4534_v55  ;;  %3479 = vmatprep.subr.bf16.mxu1 %v4620_v9  ;;  %v208_v27 = vpop.f32.mrb[13].mxu0  ;;  %3509 = vmatpush3.bf16.msra.mxu0 %v4614_v6 }
 0x122   :  { %403 = vmatmul.mubr.f32.gmra.mrb[10].mxu1 %v232_v29  ;;  %3073 = vmatprep.mubr.f32.mxu0 %v237_v18  ;;  %v209_v36 = vadd.f32 %v4534_v55, %v208_v27  ;;  %v722_v29 = vld [vmem:[#allocation3 + $0x150] sm:$0xff] }
 0x123   :  { %408 = vmatprep.mubr.f32.mxu1 %v4226_v48  ;;  %3074 = vmatmul.mubr.f32.gmra.mrb[26].mxu0 %v238_v16  ;;  %v240_v40 = vmax.f32 %v4640_v26, 0.0  ;;  %v4671_v8 = vpack.c.bf16 %v725_v58, %v722_v29 }
 0x124   :  { %v239_v42 = vmax.f32 %v209_v36, 0.0  ;;  %3481 = vmatpush1.bf16.msra.mxu1 %v4634_v23  ;;  %v3025_v43 = vpop.f32.mrb[14].mxu0  ;;  %3511 = vmatprep.subr.bf16.mxu0 %v4637_v25 }
 0x125   :  { %v224_v49 = vadd.f32 %v3025_v43, %v4534_v55  ;;  %3483 = vmatprep.subr.bf16.mxu1 %v4643_v28  ;;  %v218_v53 = vpop.f32.mrb[15].mxu0  ;;  %3513 = vmatpush3.bf16.msra.mxu0 %v4637_v25 }
 0x126   :  { %409 = vmatmul.mubr.f32.gmra.mrb[12].mxu1 %v233_v45  ;;  %3076 = vmatprep.mubr.f32.mxu0 %v239_v42  ;;  %v219_v62 = vadd.f32 %v4534_v55, %v218_v53  ;;  %v4685_v55 = vld [vmem:[%s5236_s1] sm:$0xff] }
 0x127   :  { %414 = vmatprep.mubr.f32.mxu1 %v4226_v48  ;;  %3077 = vmatmul.mubr.f32.gmra.mrb[28].mxu0 %v240_v40  ;;  %v242_v2 = vmax.f32 %v224_v49, 0.0 }
 0x128   :  { %v241_v5 = vmax.f32 %v219_v62, 0.0  ;;  %3485 = vmatpush1.bf16.msra.mxu1 %v4656_v20  ;;  %3515 = vmatprep.subr.bf16.mxu0 %v4659_v46 }
 0x129   :  { %3487 = vmatprep.subr.bf16.mxu1 %v4663_v57  ;;  %3517 = vmatpush3.bf16.msra.mxu0 %v4659_v46 }
 0x12a   :  { %415 = vmatmul.mubr.f32.gmra.mrb[14].mxu1 %v234_v44  ;;  %3079 = vmatprep.mubr.f32.mxu0 %v241_v5  ;;  %v294_v44 = vshrl.u32 %v293_v41, 7 }
 0x12b   :  { %420 = vmatprep.mubr.f32.mxu1 %v4226_v48  ;;  %3080 = vmatmul.mubr.f32.gmra.mrb[30].mxu0 %v242_v2 }
 0x12c   :  { %3489 = vmatpush1.bf16.msra.mxu1 %v4671_v8  ;;  %3519 = vmatprep.subr.bf16.mxu0 %v4674_v10  ;;  %v303_v45 = vsub.s32 2, %v294_v44 }
 0x12d   :  { %3521 = vmatpush3.bf16.msra.mxu0 %v4674_v10  ;;  %3114 = vmatprep.mubr.f32.mxu0 %v4685_v55 }
 0x12e   :  { %421 = vmatmul.mubr.f32.gmra.mrb[16].mxu1 %v235_v1  ;;  %3523 = vmatprep.subr.bf16.mxu1 %v4525_v51  ;;  %v4755_v1 = vrot.slane %v291_v52, %v303_v45 }
 0x12f   :  { %426 = vmatprep.mubr.f32.mxu1 %v4226_v48  ;;  %3555 = vmatprep.subr.bf16.mxu0 %v4528_v54 }
 0x130   :  { %3115 = vmatmul.mubr.f32.vlgmr.msra.gmra.mrb[32].mxu0 %v4697_v35 }
 0x131   :  { %3557 = vmatpush3.bf16.msra.mxu0 %v4528_v54 }
 0x132   :  { %427 = vmatmul.mubr.f32.gmra.mrb[18].mxu1 %v236_v63  ;;  %3559 = vmatprep.subr.bf16.mxu0 %v4552_v19 }
 0x133   :  { %432 = vmatprep.mubr.f32.mxu1 %v4226_v48 }
 0x135   :  { %3561 = vmatpush3.bf16.msra.mxu0 %v4552_v19 }
 0x136   :  { %433 = vmatmul.mubr.f32.gmra.mrb[20].mxu1 %v237_v18  ;;  %3563 = vmatprep.subr.bf16.mxu0 %v4570_v34 }
 0x137   :  { %438 = vmatprep.mubr.f32.mxu1 %v4226_v48 }
 0x139   :  { %3565 = vmatpush3.bf16.msra.mxu0 %v4570_v34 }
 0x13a   :  { %439 = vmatmul.mubr.f32.gmra.mrb[22].mxu1 %v238_v16  ;;  %3567 = vmatprep.subr.bf16.mxu0 %v4591_v50 }
 0x13b   :  { %444 = vmatprep.mubr.f32.mxu1 %v4226_v48 }
 0x13d   :  { %3569 = vmatpush3.bf16.msra.mxu0 %v4591_v50 }
 0x13e   :  { %445 = vmatmul.mubr.f32.gmra.mrb[24].mxu1 %v239_v42  ;;  %3571 = vmatprep.subr.bf16.mxu0 %v4614_v6 }
 0x13f   :  { %450 = vmatprep.mubr.f32.mxu1 %v4226_v48 }
 0x141   :  { %3573 = vmatpush3.bf16.msra.mxu0 %v4614_v6 }
 0x142   :  { %451 = vmatmul.mubr.f32.gmra.mrb[26].mxu1 %v240_v40  ;;  %3575 = vmatprep.subr.bf16.mxu0 %v4637_v25 }
 0x143   :  { %456 = vmatprep.mubr.f32.mxu1 %v4226_v48 }
 0x145   :  { %3577 = vmatpush3.bf16.msra.mxu0 %v4637_v25 }
 0x146   :  { %457 = vmatmul.mubr.f32.gmra.mrb[28].mxu1 %v241_v5  ;;  %3579 = vmatprep.subr.bf16.mxu0 %v4659_v46  ;;  %v295_v5 = vsub.s32 0, %v294_v44 }
 0x147   :  { %462 = vmatprep.mubr.f32.mxu1 %v4226_v48 }
 0x148   :  { %v4799_v41 = vrot.slane %v291_v52, %v295_v5 }
 0x149   :  { %3581 = vmatpush3.bf16.msra.mxu0 %v4659_v46 }
 0x14a   :  { %463 = vmatmul.mubr.f32.gmra.mrb[30].mxu1 %v242_v2  ;;  %3583 = vmatprep.subr.bf16.mxu0 %v4674_v10 }
 0x14b   :  { %792 = vmatprep.mubr.f32.mxu1 %v4226_v48 }
 0x14d   :  { %3585 = vmatpush3.bf16.msra.mxu0 %v4674_v10 }
 0x14e   :  { %793 = vmatmul.mubr.f32.vlgmr.msra.gmra.mrb[0].mxu1 %v4685_v55  ;;  %3619 = vmatprep.subr.bf16.mxu0 %v4528_v54 }
 0x14f   :  { %798 = vmatprep.mubr.f32.mxu1 %v4226_v48  ;;  %3525 = vmatpush1.bf16.msra.mxu1 %v4538_v0 }
 0x150   :  { %3527 = vmatprep.subr.bf16.mxu1 %v4540_v3 }
 0x152   :  { %799 = vmatmul.mubr.f32.gmra.mrb[2].mxu1 %v4697_v35 }
 0x153   :  { %3529 = vmatpush1.bf16.msra.mxu1 %v4550_v17  ;;  %1045 = vmatprep.mubr.f32.mxu1 %v4226_v48 }
 0x154   :  { %3531 = vmatprep.subr.bf16.mxu1 %v4557_v22 }
 0x157   :  { %3533 = vmatpush1.bf16.msra.mxu1 %v4567_v32 }
 0x158   :  { %3535 = vmatprep.subr.bf16.mxu1 %v4576_v37 }
 0x15b   :  { %3537 = vmatpush1.bf16.msra.mxu1 %v4588_v47 }
 0x15c   :  { %3539 = vmatprep.subr.bf16.mxu1 %v4597_v56 }
 0x15f   :  { %3541 = vmatpush1.bf16.msra.mxu1 %v4611_v4 }
 0x160   :  { %3543 = vmatprep.subr.bf16.mxu1 %v4620_v9 }
 0x163   :  { %3545 = vmatpush1.bf16.msra.mxu1 %v4634_v23 }
 0x164   :  { %3547 = vmatprep.subr.bf16.mxu1 %v4643_v28 }
 0x167   :  { %3549 = vmatpush1.bf16.msra.mxu1 %v4656_v20 }
 0x168   :  { %3551 = vmatprep.subr.bf16.mxu1 %v4663_v57 }
 0x16b   :  { %3553 = vmatpush1.bf16.msra.mxu1 %v4671_v8 }
 0x16c   :  { %3587 = vmatprep.subr.bf16.mxu1 %v4525_v51 }
 0x1e2   :  { %v4753_v60 = vpop.f32.mrb[16].mxu0 }
 0x1e3   :  { %v535_v63 = vpop.f32.mrb[17].mxu0 }
 0x1e6   :  { %v3063_v7 = vpop.f32.mrb[18].mxu0 }
 0x1e7   :  { %v4758_v11 = vadd.f32 %v3063_v7, %v4755_v1  ;;  %v545_v12 = vpop.f32.mrb[19].mxu0 }
 0x1e8   :  { %v4761_v13 = vadd.f32 %v545_v12, %v4755_v1  ;;  %v299_v12 = vsub.s32 1, %v294_v44 }
 0x1ea   :  { %v3066_v51 = vpop.f32.mrb[20].mxu0 }
 0x1eb   :  { %v4764_v14 = vadd.f32 %v3066_v51, %v4755_v1  ;;  %v555_v15 = vpop.f32.mrb[21].mxu0 }
 0x1ec   :  { %v4767_v16 = vadd.f32 %v555_v15, %v4755_v1 }
 0x1ee   :  { %v3069_v18 = vpop.f32.mrb[22].mxu0 }
 0x1ef   :  { %v4770_v21 = vadd.f32 %v3069_v18, %v4755_v1  ;;  %v565_v24 = vpop.f32.mrb[23].mxu0 }
 0x1f0   :  { %v4773_v26 = vadd.f32 %v565_v24, %v4755_v1  ;;  %v4802_v24 = vrot.slane %v291_v52, %v299_v12  ;;  %v4810_v52 = vld [vmem:[%s5242_s7] ss:$0 sm:$0xff] }
 0x1f2   :  { %v3072_v27 = vpop.f32.mrb[24].mxu0 }
 0x1f3   :  { %v4776_v30 = vadd.f32 %v3072_v27, %v4755_v1  ;;  %v575_v31 = vpop.f32.mrb[25].mxu0 }
 0x1f4   :  { %v4779_v33 = vadd.f32 %v575_v31, %v4755_v1 }
 0x1f6   :  { %v3075_v36 = vpop.f32.mrb[26].mxu0 }
 0x1f7   :  { %v4782_v38 = vadd.f32 %v3075_v36, %v4755_v1  ;;  %v585_v39 = vpop.f32.mrb[27].mxu0 }
 0x1f8   :  { %v4785_v40 = vadd.f32 %v585_v39, %v4755_v1 }
 0x1fa   :  { %v3078_v42 = vpop.f32.mrb[28].mxu0 }
 0x1fb   :  { %v4788_v43 = vadd.f32 %v3078_v42, %v4755_v1  ;;  %v595_v29 = vpop.f32.mrb[29].mxu0 }
 0x1fc   :  { %v4791_v49 = vadd.f32 %v595_v29, %v4755_v1 }
 0x1fe   :  { %v3081_v53 = vpop.f32.mrb[30].mxu0 }
 0x1ff   :  { %v4794_v58 = vadd.f32 %v3081_v53, %v4755_v1  ;;  %v605_v59 = vpop.f32.mrb[31].mxu0 }
 0x200   :  { %v4797_v61 = vadd.f32 %v605_v59, %v4755_v1 }
 0x203   :  { %v3116_v62 = vpop.f32.mrb[32].mxu0 }
 0x204   :  { %v871_v2 = vpop.f32.mrb[33].mxu0 }
 0x221   :  { %v794_v45 = vpop.f32.mrb[0].mxu1 }
 0x222   :  { %v3970_v7 = vadd.f32 %v794_v45, %v4799_v41  ;;  %v796_v51 = vpop.f32.mrb[1].mxu1 }
 0x223   :  { %v3971_v39 = vadd.f32 %v796_v51, %v4802_v24 }
 0x224   :  { %v2716_v15 = vmul.f32 -1.442695, %v3970_v7  ;;  %v908_v7 = vadd.f32 %v4810_v52, %v871_v2 }
 0x225   :  { %v800_v18 = vpop.f32.mrb[2].mxu1  ;;  %v2718_v42 = vmul.f32 -1.442695, %v3971_v39 }
 0x226   :  { %4038 = vpow2.f32 %v2716_v15  ;;  %v3972_v27 = vadd.f32 %v800_v18, %v4799_v41  ;;  %v802_v31 = vpop.f32.mrb[3].mxu1  ;;  %v536_v15 = vadd.f32 %v535_v63, %v4755_v1 }
 0x227   :  { %v3973_v29 = vadd.f32 %v802_v31, %v4802_v24 }
 0x228   :  { %v2717_v36 = vmul.f32 -1.442695, %v3972_v27 }
 0x229   :  { %v2719_v44 = vmul.f32 -1.442695, %v3973_v29  ;;  %v541_v29 = vadd.f32 %v4753_v60, %v4755_v1 }
 0x22a   :  { %4040 = vpow2.f32 %v2717_v36  ;;  %v909_v36 = vadd.f32 %v3116_v62, %v4810_v52 }
 0x22b   :  { %4042 = vpow2.f32 %v2718_v42 }
 0x230   :  { %v4039_v53 = vpop.eup %4038 }
 0x231   :  { %v888_v59 = vadd.f32 1.0, %v4039_v53 }
 0x233   :  { %4044 = vrcp.f32 %v888_v59 }
 0x234   :  { %v4041_v5 = vpop.eup %4040  ;;  %4046 = vpow2.f32 %v2719_v44 }
 0x235   :  { %v889_v45 = vadd.f32 1.0, %v4041_v5  ;;  %v4043_v12 = vpop.eup %4042 }
 0x236   :  { %v902_v31 = vadd.f32 1.0, %v4043_v12 }
 0x237   :  { %4048 = vrcp.f32 %v889_v45 }
 0x23d   :  { %v4045_v51 = vpop.eup %4044 }
 0x23e   :  { %v910_v18 = vmul.f32 %v4045_v51, %v908_v7  ;;  %v4047_v27 = vpop.eup %4046 }
 0x23f   :  { %v903_v59 = vadd.f32 1.0, %v4047_v27 }
 0x240   :  { %v912_v39 = vadd.f32 %v910_v18, %v536_v15 }
 0x241   :  { %v4049_v42 = vpop.eup %4048 }
 0x242   :  { %v911_v53 = vmul.f32 %v4049_v42, %v909_v36  ;;  %4050 = vtanh.f32 %v912_v39 }
 0x243   :  { %4052 = vrcp.f32 %v902_v31 }
 0x244   :  { %v913_v44 = vadd.f32 %v911_v53, %v541_v29 }
 0x246   :  { %4054 = vtanh.f32 %v913_v44 }
 0x247   :  { %4056 = vrcp.f32 %v903_v59 }
 0x24c   :  { %v4051_v2 = vpop.eup %4050 }
 0x24d   :  { %v916_v63 = vsub.f32 %v4685_v55, %v4051_v2  ;;  %v4053_v5 = vpop.eup %4052 }
 0x24f   :  { %v918_v45 = vmul.f32 %v4053_v5, %v916_v63 }
 0x250   :  { %v4055_v7 = vpop.eup %4054 }
 0x251   :  { %v4818_v12 = vadd.f32 %v4051_v2, %v918_v45  ;;  %v917_v62 = vsub.f32 %v4697_v35, %v4055_v7  ;;  %v4057_v51 = vpop.eup %4056 }
 0x253   :  { %922 = vst [vmem:[%s5243_s8] sm:$0xff] %v4818_v12  ;;  %1046 = vmatmul.mubr.f32.vlgmr.msra.gmra.mrb[4].mxu1 %v4818_v12  ;;  %3149 = vmatprep.mubr.f32.mxu0 %v4818_v12  ;;  %v919_v60 = vmul.f32 %v4057_v51, %v917_v62 }
 0x254   :  { %1051 = vmatprep.mubr.f32.mxu1 %v4226_v48  ;;  %3589 = vmatpush1.bf16.msra.mxu1 %v4538_v0 }
 0x255   :  { %v4829_v55 = vadd.f32 %v4055_v7, %v919_v60  ;;  %3591 = vmatprep.subr.bf16.mxu1 %v4540_v3 }
 0x257   :  { %923 = vst [vmem:[%s5243_s8 + $0x8] sm:$0xff] %v4829_v55  ;;  %1052 = vmatmul.mubr.f32.gmra.mrb[6].mxu1 %v4829_v55  ;;  %3150 = vmatmul.mubr.f32.vlgmr.msra.gmra.mrb[34].mxu0 %v4829_v55 }
 0x258   :  { %3593 = vmatpush1.bf16.msra.mxu1 %v4550_v17  ;;  %3621 = vmatpush3.bf16.msra.mxu0 %v4528_v54 }
 0x259   :  { %3595 = vmatprep.subr.bf16.mxu1 %v4557_v22  ;;  %3623 = vmatprep.subr.bf16.mxu0 %v4552_v19 }
 0x25a   :  { %1299 = vmatprep.mubr.f32.mxu1 %v4226_v48 }
 0x25c   :  { %3597 = vmatpush1.bf16.msra.mxu1 %v4567_v32  ;;  %3625 = vmatpush3.bf16.msra.mxu0 %v4552_v19 }
 0x25d   :  { %3599 = vmatprep.subr.bf16.mxu1 %v4576_v37  ;;  %3627 = vmatprep.subr.bf16.mxu0 %v4570_v34 }
 0x260   :  { %3601 = vmatpush1.bf16.msra.mxu1 %v4588_v47  ;;  %3629 = vmatpush3.bf16.msra.mxu0 %v4570_v34 }
 0x261   :  { %3603 = vmatprep.subr.bf16.mxu1 %v4597_v56  ;;  %3631 = vmatprep.subr.bf16.mxu0 %v4591_v50 }
 0x264   :  { %3605 = vmatpush1.bf16.msra.mxu1 %v4611_v4  ;;  %3633 = vmatpush3.bf16.msra.mxu0 %v4591_v50 }
 0x265   :  { %3607 = vmatprep.subr.bf16.mxu1 %v4620_v9  ;;  %3635 = vmatprep.subr.bf16.mxu0 %v4614_v6 }
 0x268   :  { %3609 = vmatpush1.bf16.msra.mxu1 %v4634_v23  ;;  %3637 = vmatpush3.bf16.msra.mxu0 %v4614_v6 }
 0x269   :  { %3611 = vmatprep.subr.bf16.mxu1 %v4643_v28  ;;  %3639 = vmatprep.subr.bf16.mxu0 %v4637_v25 }
 0x26c   :  { %3613 = vmatpush1.bf16.msra.mxu1 %v4656_v20  ;;  %3641 = vmatpush3.bf16.msra.mxu0 %v4637_v25 }
 0x26d   :  { %3615 = vmatprep.subr.bf16.mxu1 %v4663_v57  ;;  %3643 = vmatprep.subr.bf16.mxu0 %v4659_v46 }
 0x270   :  { %3617 = vmatpush1.bf16.msra.mxu1 %v4671_v8  ;;  %3645 = vmatpush3.bf16.msra.mxu0 %v4659_v46 }
 0x271   :  { %3647 = vmatprep.subr.bf16.mxu0 %v4674_v10 }
 0x274   :  { %3649 = vmatpush3.bf16.msra.mxu0 %v4674_v10 }
 0x275   :  { %3683 = vmatprep.subr.bf16.mxu0 %v4528_v54 }
 0x326   :  { %v1047_v0 = vpop.f32.mrb[4].mxu1 }
 0x327   :  { %v3974_v3 = vadd.f32 %v1047_v0, %v4799_v41  ;;  %v1049_v17 = vpop.f32.mrb[5].mxu1 }
 0x328   :  { %v3975_v23 = vadd.f32 %v1049_v17, %v4802_v24 }
 0x329   :  { %v2720_v22 = vmul.f32 -1.442695, %v3974_v3 }
 0x32a   :  { %v1053_v32 = vpop.f32.mrb[6].mxu1  ;;  %v3151_v37 = vpop.f32.mrb[34].mxu0  ;;  %v2722_v28 = vmul.f32 -1.442695, %v3975_v23  ;;  %v1460_v23 = vld [vmem:[#allocation3 + $0x98] sm:$0xff] }
 0x32b   :  { %4058 = vpow2.f32 %v2720_v22  ;;  %v3976_v47 = vadd.f32 %v1053_v32, %v4799_v41  ;;  %v1055_v56 = vpop.f32.mrb[7].mxu1  ;;  %v1124_v4 = vpop.f32.mrb[35].mxu0  ;;  %v1162_v29 = vadd.f32 %v3151_v37, %v4810_v52  ;;  %v1450_v22 = vld [vmem:[#allocation3 + $0x48] sm:$0xff]  ;;  %v1457_v37 = vld [vmem:[#allocation3 + $0x80] sm:$0xff] }
 0x32c   :  { %v3977_v20 = vadd.f32 %v1055_v56, %v4802_v24  ;;  %v1161_v27 = vadd.f32 %v4810_v52, %v1124_v4  ;;  %v1453_v56 = vld [vmem:[#allocation3 + $0x60] sm:$0xff]  ;;  %v1456_v4 = vld [vmem:[#allocation3 + $0x78] sm:$0xff] }
 0x32d   :  { %v2721_v9 = vmul.f32 -1.442695, %v3976_v47 }
 0x32e   :  { %v2723_v35 = vmul.f32 -1.442695, %v3977_v20 }
 0x32f   :  { %4060 = vpow2.f32 %v2721_v9  ;;  %v4925_v9 = vpack.c.bf16 %v1456_v4, %v1453_v56 }
 0x330   :  { %4062 = vpow2.f32 %v2722_v28  ;;  %v1463_v28 = vld [vmem:[#allocation3 + $0xb0] sm:$0xff] }
 0x331   :  { %v4929_v20 = vpack.c.bf16 %v1463_v28, %v1460_v23 }
 0x335   :  { %v4059_v57 = vpop.eup %4058 }
 0x336   :  { %v1141_v8 = vadd.f32 1.0, %v4059_v57  ;;  %v1459_v57 = vld [vmem:[#allocation3 + $0x90] sm:$0xff] }
 0x338   :  { %4064 = vrcp.f32 %v1141_v8  ;;  %v1462_v8 = vld [vmem:[#allocation3 + $0xa8] sm:$0xff] }
 0x339   :  { %v4061_v1 = vpop.eup %4060  ;;  %4066 = vpow2.f32 %v2723_v35  ;;  %v4931_v35 = vpack.c.bf16 %v1462_v8, %v1459_v57 }
 0x33a   :  { %v1142_v15 = vadd.f32 1.0, %v4061_v1  ;;  %v4063_v18 = vpop.eup %4062  ;;  %v1466_v1 = vld [vmem:[#allocation3 + $0xc8] sm:$0xff] }
 0x33b   :  { %v1155_v42 = vadd.f32 1.0, %v4063_v18 }
 0x33c   :  { %4068 = vrcp.f32 %v1142_v15  ;;  %v1469_v15 = vld [vmem:[#allocation3 + $0xe0] sm:$0xff] }
 0x33d   :  { %v4935_v18 = vpack.c.bf16 %v1469_v15, %v1466_v1 }
 0x342   :  { %v4065_v31 = vpop.eup %4064 }
 0x343   :  { %v1163_v36 = vmul.f32 %v4065_v31, %v1161_v27  ;;  %v4067_v39 = vpop.eup %4066  ;;  %v1465_v27 = vld [vmem:[#allocation3 + $0xc0] sm:$0xff]  ;;  %v1468_v31 = vld [vmem:[#allocation3 + $0xd8] sm:$0xff] }
 0x344   :  { %v1156_v63 = vadd.f32 1.0, %v4067_v39  ;;  %v1472_v39 = vld [vmem:[#allocation3 + $0xf8] sm:$0xff] }
 0x345   :  { %v1165_v53 = vadd.f32 %v1163_v36, %v4761_v13  ;;  %v4937_v36 = vpack.c.bf16 %v1468_v31, %v1465_v27 }
 0x346   :  { %v4069_v59 = vpop.eup %4068 }
 0x347   :  { %v1164_v44 = vmul.f32 %v4069_v59, %v1162_v29  ;;  %4070 = vtanh.f32 %v1165_v53  ;;  %v1471_v53 = vld [vmem:[#allocation3 + $0xf0] sm:$0xff]  ;;  %v1474_v59 = vld [vmem:[#allocation3 + $0x108] sm:$0xff] }
 0x348   :  { %4072 = vrcp.f32 %v1155_v42  ;;  %v1475_v42 = vld [vmem:[#allocation3 + $0x110] sm:$0xff] }
 0x349   :  { %v1166_v2 = vadd.f32 %v1164_v44, %v4758_v11  ;;  %v4941_v29 = vpack.c.bf16 %v1475_v42, %v1472_v39  ;;  %v4943_v44 = vpack.c.bf16 %v1474_v59, %v1471_v53 }
 0x34b   :  { %4074 = vtanh.f32 %v1166_v2  ;;  %v1478_v2 = vld [vmem:[#allocation3 + $0x128] sm:$0xff] }
 0x34c   :  { %4076 = vrcp.f32 %v1156_v63  ;;  %v1481_v63 = vld [vmem:[#allocation3 + $0x140] sm:$0xff] }
 0x351   :  { %v4071_v5 = vpop.eup %4070 }
 0x352   :  { %v1169_v45 = vsub.f32 %v4818_v12, %v4071_v5  ;;  %v4073_v7 = vpop.eup %4072 }
 0x354   :  { %v1171_v62 = vmul.f32 %v4073_v7, %v1169_v45  ;;  %v4946_v45 = vpack.c.bf16 %v1481_v63, %v1478_v2  ;;  %v1480_v7 = vld [vmem:[#allocation3 + $0x138] sm:$0xff] }
 0x355   :  { %v4075_v51 = vpop.eup %4074 }
 0x356   :  { %v4877_v60 = vadd.f32 %v4071_v5, %v1171_v62  ;;  %v1170_v0 = vsub.f32 %v4829_v55, %v4075_v51  ;;  %v4077_v13 = vpop.eup %4076  ;;  %v1444_v55 = vld [vmem:[#allocation3 + $0x18] sm:$0xff]  ;;  %v1477_v5 = vld [vmem:[#allocation3 + $0x120] sm:$0xff] }
 0x357   :  { %v1484_v62 = vld [vmem:[#allocation3 + $0x158] sm:$0xff] }
 0x358   :  { %2724 = vst [vmem:[%s5243_s8 + $0x10] sm:$0xff] %v4877_v60  ;;  %1300 = vmatmul.mubr.f32.vlgmr.msra.gmra.mrb[8].mxu1 %v4877_v60  ;;  %3184 = vmatprep.mubr.f32.mxu0 %v4877_v60  ;;  %v1172_v11 = vmul.f32 %v4077_v13, %v1170_v0  ;;  %v4949_v0 = vpack.c.bf16 %v1480_v7, %v1477_v5 }
 0x359   :  { %1305 = vmatprep.mubr.f32.mxu1 %v4226_v48 }
 0x35a   :  { %v4887_v12 = vadd.f32 %v4075_v51, %v1172_v11  ;;  %v1487_v51 = vld [vmem:[#allocation3 + $0x170] sm:$0xff] }
 0x35b   :  { %v4952_v13 = vpack.c.bf16 %v1487_v51, %v1484_v62  ;;  %v1483_v11 = vld [vmem:[#allocation3 + $0x150] sm:$0xff] }
 0x35c   :  { %2725 = vst [vmem:[%s5243_s8 + $0x18] sm:$0xff] %v4887_v12  ;;  %1306 = vmatmul.mubr.f32.gmra.mrb[10].mxu1 %v4887_v12  ;;  %3185 = vmatmul.mubr.f32.vlgmr.msra.gmra.mrb[36].mxu0 %v4887_v12 }
 0x35d   :  { %3685 = vmatpush3.bf16.msra.mxu0 %v4528_v54  ;;  %1553 = vmatprep.mubr.f32.mxu1 %v4226_v48  ;;  %v1442_v54 = vld [vmem:[#allocation3 + $0x8] sm:$0xff] }
 0x35e   :  { %3687 = vmatprep.subr.bf16.mxu0 %v4552_v19 }
 0x361   :  { %3689 = vmatpush3.bf16.msra.mxu0 %v4552_v19  ;;  %v1445_v19 = vld [vmem:[#allocation3 + $0x20] sm:$0xff] }
 0x362   :  { %3691 = vmatprep.subr.bf16.mxu0 %v4570_v34 }
 0x365   :  { %3693 = vmatpush3.bf16.msra.mxu0 %v4570_v34  ;;  %v4911_v34 = vpack.c.bf16 %v1445_v19, %v1442_v54  ;;  %v1486_v54 = vld [vmem:[#allocation3 + $0x168] sm:$0xff] }
 0x366   :  { %3695 = vmatprep.subr.bf16.mxu0 %v4591_v50  ;;  %v4955_v19 = vpack.c.bf16 %v1486_v54, %v1483_v11 }
 0x367   :  { %3651 = vmatprep.subr.bf16.mxu1 %v4911_v34 }
 0x369   :  { %3697 = vmatpush3.bf16.msra.mxu0 %v4591_v50  ;;  %v1441_v50 = vld [vmem:[#allocation3] sm:$0xff] }
 0x36a   :  { %3699 = vmatprep.subr.bf16.mxu0 %v4614_v6  ;;  %v4913_v3 = vpack.c.bf16 %v1444_v55, %v1441_v50 }
 0x36c   :  { %3653 = vmatpush1.bf16.msra.mxu1 %v4913_v3 }
 0x36d   :  { %3701 = vmatpush3.bf16.msra.mxu0 %v4614_v6  ;;  %v1448_v6 = vld [vmem:[#allocation3 + $0x38] sm:$0xff] }
 0x36e   :  { %3703 = vmatprep.subr.bf16.mxu0 %v4637_v25 }
 0x371   :  { %3705 = vmatpush3.bf16.msra.mxu0 %v4637_v25  ;;  %v1451_v25 = vld [vmem:[#allocation3 + $0x50] sm:$0xff] }
 0x372   :  { %3707 = vmatprep.subr.bf16.mxu0 %v4659_v46  ;;  %v4917_v17 = vpack.c.bf16 %v1451_v25, %v1448_v6 }
 0x374   :  { %3655 = vmatprep.subr.bf16.mxu1 %v4917_v17 }
 0x375   :  { %3709 = vmatpush3.bf16.msra.mxu0 %v4659_v46  ;;  %v1447_v46 = vld [vmem:[#allocation3 + $0x30] sm:$0xff] }
 0x376   :  { %3711 = vmatprep.subr.bf16.mxu0 %v4674_v10  ;;  %v4919_v32 = vpack.c.bf16 %v1450_v22, %v1447_v46 }
 0x378   :  { %3657 = vmatpush1.bf16.msra.mxu1 %v4919_v32 }
 0x379   :  { %3713 = vmatpush3.bf16.msra.mxu0 %v4674_v10  ;;  %v1454_v10 = vld [vmem:[#allocation3 + $0x68] sm:$0xff] }
 0x37a   :  { %v4923_v47 = vpack.c.bf16 %v1457_v37, %v1454_v10 }
 0x37c   :  { %3659 = vmatprep.subr.bf16.mxu1 %v4923_v47 }
 0x37d   :  { %3661 = vmatpush1.bf16.msra.mxu1 %v4925_v9 }
 0x37e   :  { %3663 = vmatprep.subr.bf16.mxu1 %v4929_v20 }
 0x381   :  { %3665 = vmatpush1.bf16.msra.mxu1 %v4931_v35 }
 0x382   :  { %3667 = vmatprep.subr.bf16.mxu1 %v4935_v18 }
 0x385   :  { %3669 = vmatpush1.bf16.msra.mxu1 %v4937_v36 }
 0x386   :  { %3671 = vmatprep.subr.bf16.mxu1 %v4941_v29 }
 0x389   :  { %3673 = vmatpush1.bf16.msra.mxu1 %v4943_v44 }
 0x38a   :  { %3675 = vmatprep.subr.bf16.mxu1 %v4946_v45 }
 0x38d   :  { %3677 = vmatpush1.bf16.msra.mxu1 %v4949_v0 }
 0x38e   :  { %3679 = vmatprep.subr.bf16.mxu1 %v4952_v13 }
 0x391   :  { %3681 = vmatpush1.bf16.msra.mxu1 %v4955_v19 }
 0x392   :  { %3715 = vmatprep.subr.bf16.mxu1 %v4911_v34 }
 0x42b   :  { %v1301_v50 = vpop.f32.mrb[8].mxu1 }
 0x42c   :  { %v3978_v55 = vadd.f32 %v1301_v50, %v4799_v41  ;;  %v1303_v6 = vpop.f32.mrb[9].mxu1 }
 0x42d   :  { %v3979_v23 = vadd.f32 %v1303_v6, %v4802_v24 }
 0x42e   :  { %v2726_v25 = vmul.f32 -1.442695, %v3978_v55 }
 0x42f   :  { %v1307_v46 = vpop.f32.mrb[10].mxu1  ;;  %v3186_v22 = vpop.f32.mrb[36].mxu0  ;;  %v2728_v28 = vmul.f32 -1.442695, %v3979_v23  ;;  %v1706_v23 = vld [vmem:[#allocation3 + $0x58] sm:$0xff] }
 0x430   :  { %4078 = vpow2.f32 %v2726_v25  ;;  %v3980_v10 = vadd.f32 %v1307_v46, %v4799_v41  ;;  %v1309_v37 = vpop.f32.mrb[11].mxu1  ;;  %v1378_v56 = vpop.f32.mrb[37].mxu0  ;;  %v1416_v5 = vadd.f32 %v3186_v22, %v4810_v52 }
 0x431   :  { %v3981_v57 = vadd.f32 %v1309_v37, %v4802_v24  ;;  %v1415_v42 = vadd.f32 %v4810_v52, %v1378_v56  ;;  %v1700_v37 = vld [vmem:[#allocation3 + $0x28] sm:$0xff] }
 0x432   :  { %v2727_v4 = vmul.f32 -1.442695, %v3980_v10 }
 0x433   :  { %v2729_v15 = vmul.f32 -1.442695, %v3981_v57  ;;  %v1709_v57 = vld [vmem:[#allocation3 + $0x70] sm:$0xff] }
 0x434   :  { %4080 = vpow2.f32 %v2727_v4  ;;  %v1703_v4 = vld [vmem:[#allocation3 + $0x40] sm:$0xff] }
 0x435   :  { %4082 = vpow2.f32 %v2728_v28  ;;  %v5008_v28 = vpack.c.bf16 %v1706_v23, %v1703_v4 }
 0x43a   :  { %v4079_v8 = vpop.eup %4078 }
 0x43b   :  { %v1395_v1 = vadd.f32 1.0, %v4079_v8  ;;  %v1712_v8 = vld [vmem:[#allocation3 + $0x88] sm:$0xff] }
 0x43d   :  { %4084 = vrcp.f32 %v1395_v1  ;;  %v5012_v1 = vpack.c.bf16 %v1712_v8, %v1709_v57 }
 0x43e   :  { %v4081_v27 = vpop.eup %4080  ;;  %4086 = vpow2.f32 %v2729_v15  ;;  %v1715_v15 = vld [vmem:[#allocation3 + $0xa0] sm:$0xff] }
 0x43f   :  { %v1396_v31 = vadd.f32 1.0, %v4081_v27  ;;  %v4083_v39 = vpop.eup %4082  ;;  %v1718_v27 = vld [vmem:[#allocation3 + $0xb8] sm:$0xff] }
 0x440   :  { %v1409_v63 = vadd.f32 1.0, %v4083_v39  ;;  %v1721_v39 = vld [vmem:[#allocation3 + $0xd0] sm:$0xff] }
 0x441   :  { %4088 = vrcp.f32 %v1396_v31  ;;  %v5016_v31 = vpack.c.bf16 %v1718_v27, %v1715_v15 }
 0x447   :  { %v4085_v53 = vpop.eup %4084 }
 0x448   :  { %v1417_v59 = vmul.f32 %v4085_v53, %v1415_v42  ;;  %v4087_v2 = vpop.eup %4086  ;;  %v1724_v42 = vld [vmem:[#allocation3 + $0xe8] sm:$0xff] }
 0x449   :  { %v1410_v54 = vadd.f32 1.0, %v4087_v2  ;;  %v5020_v53 = vpack.c.bf16 %v1724_v42, %v1721_v39  ;;  %v1730_v2 = vld [vmem:[#allocation3 + $0x118] sm:$0xff] }
 0x44a   :  { %v1419_v7 = vadd.f32 %v1417_v59, %v4767_v16  ;;  %v1727_v59 = vld [vmem:[#allocation3 + $0x100] sm:$0xff] }
 0x44b   :  { %v4089_v62 = vpop.eup %4088 }
 0x44c   :  { %v1418_v51 = vmul.f32 %v4089_v62, %v1416_v5  ;;  %4090 = vtanh.f32 %v1419_v7  ;;  %v5023_v5 = vpack.c.bf16 %v1730_v2, %v1727_v59  ;;  %v1736_v7 = vld [vmem:[#allocation3 + $0x148] sm:$0xff] }
 0x44d   :  { %4092 = vrcp.f32 %v1409_v63  ;;  %v1733_v63 = vld [vmem:[#allocation3 + $0x130] sm:$0xff] }
 0x44e   :  { %v1420_v11 = vadd.f32 %v1418_v51, %v4764_v14  ;;  %v5027_v62 = vpack.c.bf16 %v1736_v7, %v1733_v63  ;;  %v1739_v51 = vld [vmem:[#allocation3 + $0x160] sm:$0xff] }
 0x450   :  { %4094 = vtanh.f32 %v1420_v11  ;;  %v1742_v11 = vld [vmem:[#allocation3 + $0x178] sm:$0xff] }
 0x451   :  { %4096 = vrcp.f32 %v1410_v54  ;;  %v5032_v54 = vpack.c.bf16 %v1742_v11, %v1739_v51 }
 0x456   :  { %v4091_v50 = vpop.eup %4090 }
 0x457   :  { %v1423_v55 = vsub.f32 %v4877_v60, %v4091_v50  ;;  %v4093_v6 = vpop.eup %4092 }
 0x459   :  { %v1425_v25 = vmul.f32 %v4093_v6, %v1423_v55 }
 0x45a   :  { %v4095_v46 = vpop.eup %4094 }
 0x45b   :  { %v4969_v10 = vadd.f32 %v4091_v50, %v1425_v25  ;;  %v1424_v22 = vsub.f32 %v4887_v12, %v4095_v46  ;;  %v4097_v16 = vpop.eup %4096  ;;  %v1697_v12 = vld [vmem:[#allocation3 + $0x10] sm:$0xff] }
 0x45c   :  { %v5004_v56 = vpack.c.bf16 %v1700_v37, %v1697_v12 }
 0x45d   :  { %2730 = vst [vmem:[%s5243_s8 + $0x20] sm:$0xff] %v4969_v10  ;;  %1554 = vmatmul.mubr.f32.vlgmr.msra.gmra.mrb[12].mxu1 %v4969_v10  ;;  %3219 = vmatprep.mubr.f32.mxu0 %v4969_v10  ;;  %v1426_v14 = vmul.f32 %v4097_v16, %v1424_v22 }
 0x45e   :  { %1559 = vmatprep.mubr.f32.mxu1 %v4226_v48  ;;  %3717 = vmatpush1.bf16.msra.mxu1 %v4913_v3 }
 0x45f   :  { %v4980_v60 = vadd.f32 %v4095_v46, %v1426_v14  ;;  %3719 = vmatprep.subr.bf16.mxu1 %v4917_v17  ;;  %3747 = vmatprep.subr.bf16.mxu0 %v5004_v56 }
 0x461   :  { %2731 = vst [vmem:[%s5243_s8 + $0x28] sm:$0xff] %v4980_v60  ;;  %1560 = vmatmul.mubr.f32.gmra.mrb[14].mxu1 %v4980_v60  ;;  %3220 = vmatmul.mubr.f32.vlgmr.msra.gmra.mrb[38].mxu0 %v4980_v60 }
 0x462   :  { %3721 = vmatpush1.bf16.msra.mxu1 %v4919_v32  ;;  %1807 = vmatprep.mubr.f32.mxu1 %v4226_v48 }
 0x463   :  { %3723 = vmatprep.subr.bf16.mxu1 %v4923_v47  ;;  %3749 = vmatpush3.bf16.msra.mxu0 %v5004_v56 }
 0x464   :  { %3751 = vmatprep.subr.bf16.mxu0 %v5008_v28 }
 0x466   :  { %3725 = vmatpush1.bf16.msra.mxu1 %v4925_v9 }
 0x467   :  { %3727 = vmatprep.subr.bf16.mxu1 %v4929_v20  ;;  %3753 = vmatpush3.bf16.msra.mxu0 %v5008_v28 }
 0x468   :  { %3755 = vmatprep.subr.bf16.mxu0 %v5012_v1 }
 0x46a   :  { %3729 = vmatpush1.bf16.msra.mxu1 %v4931_v35 }
 0x46b   :  { %3731 = vmatprep.subr.bf16.mxu1 %v4935_v18  ;;  %3757 = vmatpush3.bf16.msra.mxu0 %v5012_v1 }
 0x46c   :  { %3759 = vmatprep.subr.bf16.mxu0 %v5016_v31 }
 0x46e   :  { %3733 = vmatpush1.bf16.msra.mxu1 %v4937_v36 }
 0x46f   :  { %3735 = vmatprep.subr.bf16.mxu1 %v4941_v29  ;;  %3761 = vmatpush3.bf16.msra.mxu0 %v5016_v31 }
 0x470   :  { %3763 = vmatprep.subr.bf16.mxu0 %v5020_v53 }
 0x472   :  { %3737 = vmatpush1.bf16.msra.mxu1 %v4943_v44 }
 0x473   :  { %3739 = vmatprep.subr.bf16.mxu1 %v4946_v45  ;;  %3765 = vmatpush3.bf16.msra.mxu0 %v5020_v53 }
 0x474   :  { %3767 = vmatprep.subr.bf16.mxu0 %v5023_v5 }
 0x476   :  { %3741 = vmatpush1.bf16.msra.mxu1 %v4949_v0 }
 0x477   :  { %3743 = vmatprep.subr.bf16.mxu1 %v4952_v13  ;;  %3769 = vmatpush3.bf16.msra.mxu0 %v5023_v5 }
 0x478   :  { %3771 = vmatprep.subr.bf16.mxu0 %v5027_v62 }
 0x47a   :  { %3745 = vmatpush1.bf16.msra.mxu1 %v4955_v19 }
 0x47b   :  { %3779 = vmatprep.subr.bf16.mxu1 %v4911_v34  ;;  %3773 = vmatpush3.bf16.msra.mxu0 %v5027_v62 }
 0x47c   :  { %3775 = vmatprep.subr.bf16.mxu0 %v5032_v54 }
 0x47f   :  { %3777 = vmatpush3.bf16.msra.mxu0 %v5032_v54 }
 0x480   :  { %3811 = vmatprep.subr.bf16.mxu0 %v5004_v56 }
 0x530   :  { %v1555_v50 = vpop.f32.mrb[12].mxu1 }
 0x531   :  { %v3982_v55 = vadd.f32 %v1555_v50, %v4799_v41  ;;  %v1557_v6 = vpop.f32.mrb[13].mxu1 }
 0x532   :  { %v3983_v4 = vadd.f32 %v1557_v6, %v4802_v24 }
 0x533   :  { %v2732_v25 = vmul.f32 -1.442695, %v3982_v55 }
 0x534   :  { %v1561_v46 = vpop.f32.mrb[14].mxu1  ;;  %v3221_v22 = vpop.f32.mrb[38].mxu0  ;;  %v2734_v23 = vmul.f32 -1.442695, %v3983_v4 }
 0x535   :  { %4098 = vpow2.f32 %v2732_v25  ;;  %v3984_v16 = vadd.f32 %v1561_v46, %v4799_v41  ;;  %v1563_v14 = vpop.f32.mrb[15].mxu1  ;;  %v1632_v12 = vpop.f32.mrb[39].mxu0  ;;  %v1670_v50 = vadd.f32 %v3221_v22, %v4810_v52 }
 0x536   :  { %v3985_v57 = vadd.f32 %v1563_v14, %v4802_v24  ;;  %v1669_v2 = vadd.f32 %v4810_v52, %v1632_v12 }
 0x537   :  { %v2733_v37 = vmul.f32 -1.442695, %v3984_v16 }
 0x538   :  { %v2735_v27 = vmul.f32 -1.442695, %v3985_v57 }
 0x539   :  { %4100 = vpow2.f32 %v2733_v37 }
 0x53a   :  { %4102 = vpow2.f32 %v2734_v23 }
 0x53f   :  { %v4099_v8 = vpop.eup %4098 }
 0x540   :  { %v1649_v15 = vadd.f32 1.0, %v4099_v8 }
 0x542   :  { %4104 = vrcp.f32 %v1649_v15 }
 0x543   :  { %v4101_v39 = vpop.eup %4100  ;;  %4106 = vpow2.f32 %v2735_v27 }
 0x544   :  { %v1650_v42 = vadd.f32 1.0, %v4101_v39  ;;  %v4103_v59 = vpop.eup %4102 }
 0x545   :  { %v1663_v11 = vadd.f32 1.0, %v4103_v59 }
 0x546   :  { %4108 = vrcp.f32 %v1650_v42 }
 0x54c   :  { %v4105_v63 = vpop.eup %4104 }
 0x54d   :  { %v1671_v7 = vmul.f32 %v4105_v63, %v1669_v2  ;;  %v4107_v51 = vpop.eup %4106 }
 0x54e   :  { %v1664_v16 = vadd.f32 1.0, %v4107_v51 }
 0x54f   :  { %v1673_v55 = vadd.f32 %v1671_v7, %v4773_v26 }
 0x550   :  { %v4109_v6 = vpop.eup %4108 }
 0x551   :  { %v1672_v25 = vmul.f32 %v4109_v6, %v1670_v50  ;;  %4110 = vtanh.f32 %v1673_v55 }
 0x552   :  { %4112 = vrcp.f32 %v1663_v11 }
 0x553   :  { %v1674_v46 = vadd.f32 %v1672_v25, %v4770_v21 }
 0x555   :  { %4114 = vtanh.f32 %v1674_v46 }
 0x556   :  { %4116 = vrcp.f32 %v1664_v16 }
 0x55b   :  { %v4111_v14 = vpop.eup %4110 }
 0x55c   :  { %v1677_v12 = vsub.f32 %v4969_v10, %v4111_v14  ;;  %v4113_v37 = vpop.eup %4112 }
 0x55e   :  { %v1679_v4 = vmul.f32 %v4113_v37, %v1677_v12 }
 0x55f   :  { %v4115_v23 = vpop.eup %4114 }
 0x560   :  { %v5046_v57 = vadd.f32 %v4111_v14, %v1679_v4  ;;  %v1678_v22 = vsub.f32 %v4980_v60, %v4115_v23  ;;  %v4117_v26 = vpop.eup %4116 }
 0x562   :  { %2736 = vst [vmem:[%s5243_s8 + $0x30] sm:$0xff] %v5046_v57  ;;  %1808 = vmatmul.mubr.f32.vlgmr.msra.gmra.mrb[16].mxu1 %v5046_v57  ;;  %3254 = vmatprep.mubr.f32.mxu0 %v5046_v57  ;;  %v1680_v21 = vmul.f32 %v4117_v26, %v1678_v22 }
 0x563   :  { %1813 = vmatprep.mubr.f32.mxu1 %v4226_v48  ;;  %3781 = vmatpush1.bf16.msra.mxu1 %v4913_v3 }
 0x564   :  { %v5057_v10 = vadd.f32 %v4115_v23, %v1680_v21  ;;  %3783 = vmatprep.subr.bf16.mxu1 %v4917_v17 }
 0x566   :  { %2737 = vst [vmem:[%s5243_s8 + $0x38] sm:$0xff] %v5057_v10  ;;  %1814 = vmatmul.mubr.f32.gmra.mrb[18].mxu1 %v5057_v10  ;;  %3255 = vmatmul.mubr.f32.vlgmr.msra.gmra.mrb[40].mxu0 %v5057_v10 }
 0x567   :  { %3785 = vmatpush1.bf16.msra.mxu1 %v4919_v32  ;;  %3813 = vmatpush3.bf16.msra.mxu0 %v5004_v56 }
 0x568   :  { %3787 = vmatprep.subr.bf16.mxu1 %v4923_v47  ;;  %3815 = vmatprep.subr.bf16.mxu0 %v5008_v28 }
 0x569   :  { %2061 = vmatprep.mubr.f32.mxu1 %v4226_v48 }
 0x56b   :  { %3789 = vmatpush1.bf16.msra.mxu1 %v4925_v9  ;;  %3817 = vmatpush3.bf16.msra.mxu0 %v5008_v28 }
 0x56c   :  { %3791 = vmatprep.subr.bf16.mxu1 %v4929_v20  ;;  %3819 = vmatprep.subr.bf16.mxu0 %v5012_v1 }
 0x56f   :  { %3793 = vmatpush1.bf16.msra.mxu1 %v4931_v35  ;;  %3821 = vmatpush3.bf16.msra.mxu0 %v5012_v1 }
 0x570   :  { %3795 = vmatprep.subr.bf16.mxu1 %v4935_v18  ;;  %3823 = vmatprep.subr.bf16.mxu0 %v5016_v31 }
 0x573   :  { %3797 = vmatpush1.bf16.msra.mxu1 %v4937_v36  ;;  %3825 = vmatpush3.bf16.msra.mxu0 %v5016_v31 }
 0x574   :  { %3799 = vmatprep.subr.bf16.mxu1 %v4941_v29  ;;  %3827 = vmatprep.subr.bf16.mxu0 %v5020_v53 }
 0x577   :  { %3801 = vmatpush1.bf16.msra.mxu1 %v4943_v44  ;;  %3829 = vmatpush3.bf16.msra.mxu0 %v5020_v53 }
 0x578   :  { %3803 = vmatprep.subr.bf16.mxu1 %v4946_v45  ;;  %3831 = vmatprep.subr.bf16.mxu0 %v5023_v5 }
 0x57b   :  { %3805 = vmatpush1.bf16.msra.mxu1 %v4949_v0  ;;  %3833 = vmatpush3.bf16.msra.mxu0 %v5023_v5 }
 0x57c   :  { %3807 = vmatprep.subr.bf16.mxu1 %v4952_v13  ;;  %3835 = vmatprep.subr.bf16.mxu0 %v5027_v62 }
 0x57f   :  { %3809 = vmatpush1.bf16.msra.mxu1 %v4955_v19  ;;  %3837 = vmatpush3.bf16.msra.mxu0 %v5027_v62 }
 0x580   :  { %3839 = vmatprep.subr.bf16.mxu0 %v5032_v54  ;;  %3843 = vmatprep.subr.bf16.mxu1 %v4911_v34 }
 0x583   :  { %3841 = vmatpush3.bf16.msra.mxu0 %v5032_v54 }
 0x584   :  { %3875 = vmatprep.subr.bf16.mxu0 %v5004_v56 }
 0x635   :  { %v1809_v60 = vpop.f32.mrb[16].mxu1 }
 0x636   :  { %v3986_v8 = vadd.f32 %v1809_v60, %v4799_v41  ;;  %v1811_v15 = vpop.f32.mrb[17].mxu1 }
 0x637   :  { %v3987_v51 = vadd.f32 %v1811_v15, %v4802_v24 }
 0x638   :  { %v2738_v27 = vmul.f32 -1.442695, %v3986_v8 }
 0x639   :  { %v1815_v39 = vpop.f32.mrb[18].mxu1  ;;  %v3256_v42 = vpop.f32.mrb[40].mxu0  ;;  %v2740_v34 = vmul.f32 -1.442695, %v3987_v51 }
 0x63a   :  { %4118 = vpow2.f32 %v2738_v27  ;;  %v3988_v59 = vadd.f32 %v1815_v39, %v4799_v41  ;;  %v1817_v2 = vpop.f32.mrb[19].mxu1  ;;  %v1886_v63 = vpop.f32.mrb[41].mxu0  ;;  %v1924_v22 = vadd.f32 %v3256_v42, %v4810_v52 }
 0x63b   :  { %v3989_v11 = vadd.f32 %v1817_v2, %v4802_v24  ;;  %v1923_v14 = vadd.f32 %v4810_v52, %v1886_v63 }
 0x63c   :  { %v2739_v7 = vmul.f32 -1.442695, %v3988_v59 }
 0x63d   :  { %v2741_v6 = vmul.f32 -1.442695, %v3989_v11  ;;  %v5163_v11 = vld [vmem:[%s5242_s7] ss:$0 sm:$0xff] }
 0x63e   :  { %4120 = vpow2.f32 %v2739_v7 }
 0x63f   :  { %4122 = vpow2.f32 %v2740_v34 }
 0x644   :  { %v4119_v50 = vpop.eup %4118 }
 0x645   :  { %v1903_v55 = vadd.f32 1.0, %v4119_v50 }
 0x647   :  { %4124 = vrcp.f32 %v1903_v55 }
 0x648   :  { %v4121_v25 = vpop.eup %4120  ;;  %4126 = vpow2.f32 %v2741_v6 }
 0x649   :  { %v1904_v46 = vadd.f32 1.0, %v4121_v25  ;;  %v4123_v16 = vpop.eup %4122 }
 0x64a   :  { %v1917_v23 = vadd.f32 1.0, %v4123_v16 }
 0x64b   :  { %4128 = vrcp.f32 %v1904_v46 }
 0x651   :  { %v4125_v12 = vpop.eup %4124 }
 0x652   :  { %v1925_v37 = vmul.f32 %v4125_v12, %v1923_v14  ;;  %v4127_v4 = vpop.eup %4126 }
 0x653   :  { %v1918_v15 = vadd.f32 1.0, %v4127_v4 }
 0x654   :  { %v1927_v26 = vadd.f32 %v1925_v37, %v4779_v33 }
 0x655   :  { %v4129_v21 = vpop.eup %4128 }
 0x656   :  { %v1926_v60 = vmul.f32 %v4129_v21, %v1924_v22  ;;  %4130 = vtanh.f32 %v1927_v26 }
 0x657   :  { %4132 = vrcp.f32 %v1917_v23 }
 0x658   :  { %v1928_v8 = vadd.f32 %v1926_v60, %v4776_v30 }
 0x65a   :  { %4134 = vtanh.f32 %v1928_v8 }
 0x65b   :  { %4136 = vrcp.f32 %v1918_v15 }
 0x660   :  { %v4131_v27 = vpop.eup %4130 }
 0x661   :  { %v1931_v39 = vsub.f32 %v5046_v57, %v4131_v27  ;;  %v4133_v59 = vpop.eup %4132 }
 0x663   :  { %v1933_v2 = vmul.f32 %v4133_v59, %v1931_v39  ;;  %v2460_v59 = vld [vmem:[#allocation3 + $0x18] sm:$0xff] }
 0x664   :  { %v4135_v63 = vpop.eup %4134 }
 0x665   :  { %v5106_v7 = vadd.f32 %v4131_v27, %v1933_v2  ;;  %v1932_v52 = vsub.f32 %v5057_v10, %v4135_v63  ;;  %v4137_v33 = vpop.eup %4136 }
 0x667   :  { %2742 = vst [vmem:[%s5243_s8 + $0x40] sm:$0xff] %v5106_v7  ;;  %2062 = vmatmul.mubr.f32.vlgmr.msra.gmra.mrb[20].mxu1 %v5106_v7  ;;  %3289 = vmatprep.mubr.f32.mxu0 %v5106_v7  ;;  %v1934_v30 = vmul.f32 %v4137_v33, %v1932_v52  ;;  %v2466_v52 = vld [vmem:[#allocation3 + $0x48] sm:$0xff] }
 0x668   :  { %2067 = vmatprep.mubr.f32.mxu1 %v4226_v48  ;;  %3845 = vmatpush1.bf16.msra.mxu1 %v4913_v3 }
 0x669   :  { %v5117_v57 = vadd.f32 %v4135_v63, %v1934_v30  ;;  %3847 = vmatprep.subr.bf16.mxu1 %v4917_v17  ;;  %v2467_v63 = vld [vmem:[#allocation3 + $0x50] sm:$0xff]  ;;  %v2473_v30 = vld [vmem:[#allocation3 + $0x80] sm:$0xff] }
 0x66b   :  { %2743 = vst [vmem:[%s5243_s8 + $0x48] sm:$0xff] %v5117_v57  ;;  %2068 = vmatmul.mubr.f32.gmra.mrb[22].mxu1 %v5117_v57  ;;  %3290 = vmatmul.mubr.f32.vlgmr.msra.gmra.mrb[42].mxu0 %v5117_v57 }
 0x66c   :  { %3849 = vmatpush1.bf16.msra.mxu1 %v4919_v32  ;;  %3877 = vmatpush3.bf16.msra.mxu0 %v5004_v56 }
 0x66d   :  { %3851 = vmatprep.subr.bf16.mxu1 %v4923_v47  ;;  %3879 = vmatprep.subr.bf16.mxu0 %v5008_v28 }
 0x66e   :  { %2315 = vmatprep.mubr.f32.mxu1 %v4226_v48 }
 0x670   :  { %3853 = vmatpush1.bf16.msra.mxu1 %v4925_v9  ;;  %3881 = vmatpush3.bf16.msra.mxu0 %v5008_v28 }
 0x671   :  { %3855 = vmatprep.subr.bf16.mxu1 %v4929_v20  ;;  %3883 = vmatprep.subr.bf16.mxu0 %v5012_v1 }
 0x674   :  { %3857 = vmatpush1.bf16.msra.mxu1 %v4931_v35  ;;  %3885 = vmatpush3.bf16.msra.mxu0 %v5012_v1 }
 0x675   :  { %3859 = vmatprep.subr.bf16.mxu1 %v4935_v18  ;;  %3887 = vmatprep.subr.bf16.mxu0 %v5016_v31 }
 0x678   :  { %3861 = vmatpush1.bf16.msra.mxu1 %v4937_v36  ;;  %3889 = vmatpush3.bf16.msra.mxu0 %v5016_v31 }
 0x679   :  { %3863 = vmatprep.subr.bf16.mxu1 %v4941_v29  ;;  %3891 = vmatprep.subr.bf16.mxu0 %v5020_v53 }
 0x67c   :  { %3865 = vmatpush1.bf16.msra.mxu1 %v4943_v44  ;;  %3893 = vmatpush3.bf16.msra.mxu0 %v5020_v53 }
 0x67d   :  { %3867 = vmatprep.subr.bf16.mxu1 %v4946_v45  ;;  %3895 = vmatprep.subr.bf16.mxu0 %v5023_v5 }
 0x680   :  { %3869 = vmatpush1.bf16.msra.mxu1 %v4949_v0  ;;  %3897 = vmatpush3.bf16.msra.mxu0 %v5023_v5 }
 0x681   :  { %3871 = vmatprep.subr.bf16.mxu1 %v4952_v13  ;;  %3899 = vmatprep.subr.bf16.mxu0 %v5027_v62 }
 0x684   :  { %3873 = vmatpush1.bf16.msra.mxu1 %v4955_v19  ;;  %3901 = vmatpush3.bf16.msra.mxu0 %v5027_v62 }
 0x685   :  { %3903 = vmatprep.subr.bf16.mxu0 %v5032_v54 }
 0x688   :  { %3905 = vmatpush3.bf16.msra.mxu0 %v5032_v54 }
 0x689   :  { %3939 = vmatprep.subr.bf16.mxu0 %v5004_v56 }
 0x73a   :  { %v2063_v3 = vpop.f32.mrb[20].mxu1 }
 0x73b   :  { %v3990_v17 = vadd.f32 %v2063_v3, %v4799_v41  ;;  %v2065_v32 = vpop.f32.mrb[21].mxu1  ;;  %v2472_v3 = vld [vmem:[#allocation3 + $0x78] sm:$0xff] }
 0x73c   :  { %v3991_v44 = vadd.f32 %v2065_v32, %v4802_v24  ;;  %v2476_v32 = vld [vmem:[#allocation3 + $0x98] sm:$0xff] }
 0x73d   :  { %v2744_v47 = vmul.f32 -1.442695, %v3990_v17 }
 0x73e   :  { %v2069_v9 = vpop.f32.mrb[22].mxu1  ;;  %v3291_v20 = vpop.f32.mrb[42].mxu0  ;;  %v2746_v45 = vmul.f32 -1.442695, %v3991_v44 }
 0x73f   :  { %4138 = vpow2.f32 %v2744_v47  ;;  %v3992_v35 = vadd.f32 %v2069_v9, %v4799_v41  ;;  %v2071_v18 = vpop.f32.mrb[23].mxu1  ;;  %v2140_v36 = vpop.f32.mrb[43].mxu0  ;;  %v2178_v16 = vadd.f32 %v5163_v11, %v3291_v20  ;;  %v2479_v47 = vld [vmem:[#allocation3 + $0xb0] sm:$0xff] }
 0x740   :  { %v3993_v0 = vadd.f32 %v2071_v18, %v4802_v24  ;;  %v2177_v50 = vadd.f32 %v5163_v11, %v2140_v36  ;;  %v3918_v9 = vpack.c.bf16 %v2479_v47, %v2476_v32  ;;  %v2475_v20 = vld [vmem:[#allocation3 + $0x90] sm:$0xff]  ;;  %v2482_v36 = vld [vmem:[#allocation3 + $0xc8] sm:$0xff] }
 0x741   :  { %v2745_v29 = vmul.f32 -1.442695, %v3992_v35  ;;  %v2478_v35 = vld [vmem:[#allocation3 + $0xa8] sm:$0xff] }
 0x742   :  { %v2747_v10 = vmul.f32 -1.442695, %v3993_v0  ;;  %v3920_v18 = vpack.c.bf16 %v2478_v35, %v2475_v20  ;;  %v2484_v0 = vld [vmem:[#allocation3 + $0xd8] sm:$0xff] }
 0x743   :  { %4140 = vpow2.f32 %v2745_v29  ;;  %v2485_v29 = vld [vmem:[#allocation3 + $0xe0] sm:$0xff] }
 0x744   :  { %4142 = vpow2.f32 %v2746_v45  ;;  %v3922_v44 = vpack.c.bf16 %v2485_v29, %v2482_v36  ;;  %v2481_v45 = vld [vmem:[#allocation3 + $0xc0] sm:$0xff] }
 0x749   :  { %v4139_v13 = vpop.eup %4138 }
 0x74a   :  { %v2157_v19 = vadd.f32 1.0, %v4139_v13  ;;  %v3924_v13 = vpack.c.bf16 %v2484_v0, %v2481_v45 }
 0x74c   :  { %4144 = vrcp.f32 %v2157_v19  ;;  %v2488_v19 = vld [vmem:[#allocation3 + $0xf8] sm:$0xff] }
 0x74d   :  { %v4141_v42 = vpop.eup %4140  ;;  %4146 = vpow2.f32 %v2747_v10  ;;  %v2491_v10 = vld [vmem:[#allocation3 + $0x110] sm:$0xff] }
 0x74e   :  { %v2158_v51 = vadd.f32 1.0, %v4141_v42  ;;  %v4143_v34 = vpop.eup %4142  ;;  %v3926_v42 = vpack.c.bf16 %v2491_v10, %v2488_v19 }
 0x74f   :  { %v2171_v46 = vadd.f32 1.0, %v4143_v34  ;;  %v2490_v34 = vld [vmem:[#allocation3 + $0x108] sm:$0xff] }
 0x750   :  { %4148 = vrcp.f32 %v2158_v51  ;;  %v2487_v51 = vld [vmem:[#allocation3 + $0xf0] sm:$0xff] }
 0x756   :  { %v4145_v55 = vpop.eup %4144 }
 0x757   :  { %v2179_v6 = vmul.f32 %v4145_v55, %v2177_v50  ;;  %v4147_v25 = vpop.eup %4146  ;;  %v3928_v50 = vpack.c.bf16 %v2490_v34, %v2487_v51  ;;  %v2494_v55 = vld [vmem:[#allocation3 + $0x128] sm:$0xff] }
 0x758   :  { %v2172_v23 = vadd.f32 1.0, %v4147_v25  ;;  %v2493_v25 = vld [vmem:[#allocation3 + $0x120] sm:$0xff] }
 0x759   :  { %v2181_v14 = vadd.f32 %v2179_v6, %v4785_v40  ;;  %v2497_v6 = vld [vmem:[#allocation3 + $0x140] sm:$0xff] }
 0x75a   :  { %v4149_v12 = vpop.eup %4148 }
 0x75b   :  { %v2180_v37 = vmul.f32 %v4149_v12, %v2178_v16  ;;  %4150 = vtanh.f32 %v2181_v14  ;;  %v2496_v16 = vld [vmem:[#allocation3 + $0x138] sm:$0xff]  ;;  %v2503_v12 = vld [vmem:[#allocation3 + $0x170] sm:$0xff] }
 0x75c   :  { %4152 = vrcp.f32 %v2171_v46  ;;  %v3930_v46 = vpack.c.bf16 %v2497_v6, %v2494_v55  ;;  %v2500_v14 = vld [vmem:[#allocation3 + $0x158] sm:$0xff] }
 0x75d   :  { %v2182_v4 = vadd.f32 %v2180_v37, %v4782_v38  ;;  %v3932_v37 = vpack.c.bf16 %v2496_v16, %v2493_v25 }
 0x75f   :  { %4154 = vtanh.f32 %v2182_v4  ;;  %v3934_v4 = vpack.c.bf16 %v2503_v12, %v2500_v14 }
 0x760   :  { %4156 = vrcp.f32 %v2172_v23  ;;  %v2499_v23 = vld [vmem:[#allocation3 + $0x150] sm:$0xff] }
 0x765   :  { %v4151_v22 = vpop.eup %4150 }
 0x766   :  { %v2185_v26 = vsub.f32 %v5106_v7, %v4151_v22  ;;  %v4153_v21 = vpop.eup %4152 }
 0x768   :  { %v2187_v60 = vmul.f32 %v4153_v21, %v2185_v26 }
 0x769   :  { %v4155_v8 = vpop.eup %4154 }
 0x76a   :  { %v5170_v15 = vadd.f32 %v4151_v22, %v2187_v60  ;;  %v2186_v27 = vsub.f32 %v5117_v57, %v4155_v8  ;;  %v4157_v40 = vpop.eup %4156  ;;  %v2502_v22 = vld [vmem:[#allocation3 + $0x168] sm:$0xff] }
 0x76b   :  { %v3936_v26 = vpack.c.bf16 %v2502_v22, %v2499_v23 }
 0x76c   :  { %2748 = vst [vmem:[%s5243_s8 + $0x50] sm:$0xff] %v5170_v15  ;;  %2316 = vmatmul.mubr.f32.vlgmr.msra.gmra.mrb[24].mxu1 %v5170_v15  ;;  %3324 = vmatprep.mubr.f32.mxu0 %v5170_v15  ;;  %v2188_v38 = vmul.f32 %v4157_v40, %v2186_v27 }
 0x76d   :  { %2321 = vmatprep.mubr.f32.mxu1 %v4226_v48 }
 0x76e   :  { %v5180_v39 = vadd.f32 %v4155_v8, %v2188_v38 }
 0x770   :  { %2749 = vst [vmem:[%s5243_s8 + $0x58] sm:$0xff] %v5180_v39  ;;  %2322 = vmatmul.mubr.f32.gmra.mrb[26].mxu1 %v5180_v39  ;;  %3325 = vmatmul.mubr.f32.vlgmr.msra.gmra.mrb[44].mxu0 %v5180_v39 }
 0x771   :  { %3941 = vmatpush3.bf16.msra.mxu0 %v5004_v56  ;;  %2569 = vmatprep.mubr.f32.mxu1 %v4226_v48  ;;  %v2458_v56 = vld [vmem:[#allocation3 + $0x8] sm:$0xff] }
 0x772   :  { %3943 = vmatprep.subr.bf16.mxu0 %v5008_v28 }
 0x775   :  { %3945 = vmatpush3.bf16.msra.mxu0 %v5008_v28  ;;  %v2461_v28 = vld [vmem:[#allocation3 + $0x20] sm:$0xff] }
 0x776   :  { %3947 = vmatprep.subr.bf16.mxu0 %v5012_v1 }
 0x779   :  { %3949 = vmatpush3.bf16.msra.mxu0 %v5012_v1  ;;  %v3906_v1 = vpack.c.bf16 %v2461_v28, %v2458_v56 }
 0x77a   :  { %3951 = vmatprep.subr.bf16.mxu0 %v5016_v31 }
 0x77b   :  { %3907 = vmatprep.subr.bf16.mxu1 %v3906_v1 }
 0x77d   :  { %3953 = vmatpush3.bf16.msra.mxu0 %v5016_v31  ;;  %v2457_v31 = vld [vmem:[#allocation3] sm:$0xff] }
 0x77e   :  { %3955 = vmatprep.subr.bf16.mxu0 %v5020_v53  ;;  %v3908_v2 = vpack.c.bf16 %v2460_v59, %v2457_v31 }
 0x780   :  { %3909 = vmatpush1.bf16.msra.mxu1 %v3908_v2 }
 0x781   :  { %3957 = vmatpush3.bf16.msra.mxu0 %v5020_v53  ;;  %v2464_v53 = vld [vmem:[#allocation3 + $0x38] sm:$0xff] }
 0x782   :  { %3959 = vmatprep.subr.bf16.mxu0 %v5023_v5  ;;  %v3910_v7 = vpack.c.bf16 %v2467_v63, %v2464_v53 }
 0x784   :  { %3911 = vmatprep.subr.bf16.mxu1 %v3910_v7 }
 0x785   :  { %3961 = vmatpush3.bf16.msra.mxu0 %v5023_v5  ;;  %v2463_v5 = vld [vmem:[#allocation3 + $0x30] sm:$0xff] }
 0x786   :  { %3963 = vmatprep.subr.bf16.mxu0 %v5027_v62  ;;  %v3912_v33 = vpack.c.bf16 %v2466_v52, %v2463_v5 }
 0x788   :  { %3913 = vmatpush1.bf16.msra.mxu1 %v3912_v33 }
 0x789   :  { %3965 = vmatpush3.bf16.msra.mxu0 %v5027_v62  ;;  %v2470_v62 = vld [vmem:[#allocation3 + $0x68] sm:$0xff] }
 0x78a   :  { %3967 = vmatprep.subr.bf16.mxu0 %v5032_v54  ;;  %v3914_v57 = vpack.c.bf16 %v2473_v30, %v2470_v62 }
 0x78c   :  { %3915 = vmatprep.subr.bf16.mxu1 %v3914_v57 }
 0x78d   :  { %3969 = vmatpush3.bf16.msra.mxu0 %v5032_v54  ;;  %v2469_v54 = vld [vmem:[#allocation3 + $0x60] sm:$0xff] }
 0x78e   :  { %v3916_v17 = vpack.c.bf16 %v2472_v3, %v2469_v54 }
 0x790   :  { %3917 = vmatpush1.bf16.msra.mxu1 %v3916_v17 }
 0x791   :  { %3919 = vmatprep.subr.bf16.mxu1 %v3918_v9 }
 0x794   :  { %3921 = vmatpush1.bf16.msra.mxu1 %v3920_v18 }
 0x795   :  { %3923 = vmatprep.subr.bf16.mxu1 %v3922_v44 }
 0x798   :  { %3925 = vmatpush1.bf16.msra.mxu1 %v3924_v13 }
 0x799   :  { %3927 = vmatprep.subr.bf16.mxu1 %v3926_v42 }
 0x79c   :  { %3929 = vmatpush1.bf16.msra.mxu1 %v3928_v50 }
 0x79d   :  { %3931 = vmatprep.subr.bf16.mxu1 %v3930_v46 }
 0x7a0   :  { %3933 = vmatpush1.bf16.msra.mxu1 %v3932_v37 }
 0x7a1   :  { %3935 = vmatprep.subr.bf16.mxu1 %v3934_v4 }
 0x7a4   :  { %3937 = vmatpush1.bf16.msra.mxu1 %v3936_v26 }
 0x83f   :  { %v2317_v21 = vpop.f32.mrb[24].mxu1 }
 0x840   :  { %v3994_v60 = vadd.f32 %v2317_v21, %v4799_v41  ;;  %v2319_v8 = vpop.f32.mrb[25].mxu1 }
 0x841   :  { %v3995_v59 = vadd.f32 %v2319_v8, %v4802_v24 }
 0x842   :  { %v2750_v27 = vmul.f32 -1.442695, %v3994_v60 }
 0x843   :  { %v2323_v40 = vpop.f32.mrb[26].mxu1  ;;  %v3326_v38 = vpop.f32.mrb[44].mxu0  ;;  %v2752_v2 = vmul.f32 -1.442695, %v3995_v59 }
 0x844   :  { %4158 = vpow2.f32 %v2750_v27  ;;  %v3996_v56 = vadd.f32 %v2323_v40, %v4799_v41  ;;  %v2325_v28 = vpop.f32.mrb[27].mxu1  ;;  %v2394_v1 = vpop.f32.mrb[45].mxu0  ;;  %v2432_v32 = vadd.f32 %v5163_v11, %v3326_v38 }
 0x845   :  { %v3997_v53 = vadd.f32 %v2325_v28, %v4802_v24  ;;  %v2431_v30 = vadd.f32 %v5163_v11, %v2394_v1 }
 0x846   :  { %v2751_v31 = vmul.f32 -1.442695, %v3996_v56 }
 0x847   :  { %v2753_v5 = vmul.f32 -1.442695, %v3997_v53 }
 0x848   :  { %4160 = vpow2.f32 %v2751_v31 }
 0x849   :  { %4162 = vpow2.f32 %v2752_v2 }
 0x84e   :  { %v4159_v63 = vpop.eup %4158 }
 0x84f   :  { %v2411_v7 = vadd.f32 1.0, %v4159_v63 }
 0x851   :  { %4164 = vrcp.f32 %v2411_v7 }
 0x852   :  { %v4161_v52 = vpop.eup %4160  ;;  %4166 = vpow2.f32 %v2753_v5 }
 0x853   :  { %v2412_v33 = vadd.f32 1.0, %v4161_v52  ;;  %v4163_v62 = vpop.eup %4162 }
 0x854   :  { %v2425_v17 = vadd.f32 1.0, %v4163_v62 }
 0x855   :  { %4168 = vrcp.f32 %v2412_v33 }
 0x85b   :  { %v4165_v57 = vpop.eup %4164 }
 0x85c   :  { %v2433_v54 = vmul.f32 %v4165_v57, %v2431_v30  ;;  %v4167_v3 = vpop.eup %4166 }
 0x85d   :  { %v2426_v18 = vadd.f32 1.0, %v4167_v3 }
 0x85e   :  { %v2435_v47 = vadd.f32 %v2433_v54, %v4791_v49 }
 0x85f   :  { %v4169_v9 = vpop.eup %4168 }
 0x860   :  { %v2434_v20 = vmul.f32 %v4169_v9, %v2432_v32  ;;  %4170 = vtanh.f32 %v2435_v47 }
 0x861   :  { %4172 = vrcp.f32 %v2425_v17 }
 0x862   :  { %v2436_v35 = vadd.f32 %v2434_v20, %v4788_v43 }
 0x864   :  { %4174 = vtanh.f32 %v2436_v35 }
 0x865   :  { %4176 = vrcp.f32 %v2426_v18 }
 0x86a   :  { %v4171_v36 = vpop.eup %4170 }
 0x86b   :  { %v2439_v29 = vsub.f32 %v5170_v15, %v4171_v36  ;;  %v4173_v44 = vpop.eup %4172 }
 0x86d   :  { %v2441_v45 = vmul.f32 %v4173_v44, %v2439_v29 }
 0x86e   :  { %v4175_v0 = vpop.eup %4174 }
 0x86f   :  { %v2443_v13 = vadd.f32 %v4171_v36, %v2441_v45  ;;  %v2440_v19 = vsub.f32 %v5180_v39, %v4175_v0  ;;  %v4177_v10 = vpop.eup %4176 }
 0x871   :  { %2754 = vst [vmem:[%s5243_s8 + $0x60] sm:$0xff] %v2443_v13  ;;  %2570 = vmatmul.mubr.f32.vlgmr.msra.gmra.mrb[28].mxu1 %v2443_v13  ;;  %3359 = vmatprep.mubr.f32.mxu0 %v2443_v13  ;;  %v2442_v43 = vmul.f32 %v4177_v10, %v2440_v19 }
 0x872   :  { %2575 = vmatprep.mubr.f32.mxu1 %v4226_v48 }
 0x873   :  { %v2444_v49 = vadd.f32 %v4175_v0, %v2442_v43 }
 0x875   :  { %2755 = vst [vmem:[%s5243_s8 + $0x68] sm:$0xff] %v2444_v49  ;;  %2576 = vmatmul.mubr.f32.gmra.mrb[30].mxu1 %v2444_v49  ;;  %3360 = vmatmul.mubr.f32.vlgmr.msra.gmra.mrb[46].mxu0 %v2444_v49 }
 0x944   :  { %v2571_v15 = vpop.f32.mrb[28].mxu1 }
 0x945   :  { %v3998_v39 = vadd.f32 %v2571_v15, %v4799_v41  ;;  %v2573_v42 = vpop.f32.mrb[29].mxu1 }
 0x946   :  { %v3999_v46 = vadd.f32 %v2573_v42, %v4802_v24 }
 0x947   :  { %v2756_v51 = vmul.f32 -1.442695, %v3998_v39 }
 0x948   :  { %v2577_v34 = vpop.f32.mrb[30].mxu1  ;;  %v3361_v50 = vpop.f32.mrb[46].mxu0  ;;  %v2758_v16 = vmul.f32 -1.442695, %v3999_v46 }
 0x949   :  { %4178 = vpow2.f32 %v2756_v51  ;;  %v4000_v55 = vadd.f32 %v2577_v34, %v4799_v41  ;;  %v2579_v6 = vpop.f32.mrb[31].mxu1  ;;  %v2648_v25 = vpop.f32.mrb[47].mxu0  ;;  %v2686_v40 = vadd.f32 %v5163_v11, %v3361_v50 }
 0x94a   :  { %v4001_v14 = vadd.f32 %v2579_v6, %v4802_v24  ;;  %v2685_v41 = vadd.f32 %v5163_v11, %v2648_v25 }
 0x94b   :  { %v2757_v48 = vmul.f32 -1.442695, %v4000_v55 }
 0x94c   :  { %v2759_v4 = vmul.f32 -1.442695, %v4001_v14 }
 0x94d   :  { %4180 = vpow2.f32 %v2757_v48 }
 0x94e   :  { %4182 = vpow2.f32 %v2758_v16 }
 0x953   :  { %v4179_v12 = vpop.eup %4178 }
 0x954   :  { %v2665_v37 = vadd.f32 1.0, %v4179_v12 }
 0x956   :  { %4184 = vrcp.f32 %v2665_v37 }
 0x957   :  { %v4181_v23 = vpop.eup %4180  ;;  %4186 = vpow2.f32 %v2759_v4 }
 0x958   :  { %v2666_v22 = vadd.f32 1.0, %v4181_v23  ;;  %v4183_v26 = vpop.eup %4182 }
 0x959   :  { %v2679_v27 = vadd.f32 1.0, %v4183_v26 }
 0x95a   :  { %4188 = vrcp.f32 %v2666_v22 }
 0x960   :  { %v4185_v21 = vpop.eup %4184 }
 0x961   :  { %v2687_v60 = vmul.f32 %v4185_v21, %v2685_v41  ;;  %v4187_v8 = vpop.eup %4186 }
 0x962   :  { %v2680_v1 = vadd.f32 1.0, %v4187_v8 }
 0x963   :  { %v2689_v24 = vadd.f32 %v2687_v60, %v4797_v61 }
 0x964   :  { %v4189_v38 = vpop.eup %4188 }
 0x965   :  { %v2688_v56 = vmul.f32 %v4189_v38, %v2686_v40  ;;  %4190 = vtanh.f32 %v2689_v24 }
 0x966   :  { %4192 = vrcp.f32 %v2679_v27 }
 0x967   :  { %v2690_v28 = vadd.f32 %v2688_v56, %v4794_v58 }
 0x969   :  { %4194 = vtanh.f32 %v2690_v28 }
 0x96a   :  { %4196 = vrcp.f32 %v2680_v1 }
 0x96f   :  { %v4191_v31 = vpop.eup %4190 }
 0x970   :  { %v2693_v59 = vsub.f32 %v2443_v13, %v4191_v31  ;;  %v4193_v2 = vpop.eup %4192 }
 0x972   :  { %v2695_v53 = vmul.f32 %v4193_v2, %v2693_v59 }
 0x973   :  { %v4195_v63 = vpop.eup %4194 }
 0x974   :  { %v2694_v7 = vsub.f32 %v2444_v49, %v4195_v63  ;;  %v2697_v5 = vadd.f32 %v4191_v31, %v2695_v53  ;;  %v4197_v52 = vpop.eup %4196 }
 0x976   :  { %v2696_v11 = vmul.f32 %v4197_v52, %v2694_v7  ;;  %2760 = vst [vmem:[%s5243_s8 + $0x70] sm:$0xff] %v2697_v5 }
 0x978   :  { %v2698_v61 = vadd.f32 %v4195_v63, %v2696_v11 }
 0x97a   :  { %2761 = vst [vmem:[%s5243_s8 + $0x78] sm:$0xff] %v2698_v61 }
 0x97b   :  { %2706 = vsyncpa [#allocation4], 1 }

</bundles_post_ra>
